<compile_context>
chip_gen: v7x
topology: tpu7x:2x2x1
jax: 0.10.0
libtpu: 0.0.40
codegen_flags: <defaults>
</compile_context>

<pallas_src>
import functools

import numpy as np
import jax
import jax.numpy as jnp
from jax.experimental import pallas as pl
from jax.experimental.pallas import tpu as pltpu


_PAD_LABEL = -(1 << 30)   # sentinel label for padded rows/cols (neither fg nor bg)
_NEG_FILL = -3.0e38       # identity element for masked max (finite, no NaN/Inf)
_POS_FILL = 3.0e38        # identity element for masked min


def _quaduplet2_kernel(x_row_ref, x_col_ref, sqn_row_ref, sqn_col_ref,
                       t_col_ref, t_row_ref,
                       h1_ref, h2_ref,
                       ap_acc, an_acc, ap2_acc, an2_acc, *, margin, tk):
    """One (row-block i, column-block k) grid step.

    Folds masked e[i,j] = |x_j|^2 - 2<x_i,x_j> into lane-dense (TM,128)
    running max/min accumulators (pure VPU work per step); at the last column
    block performs the single cross-lane reduction, adds |x_i|^2, clamps,
    takes sqrt and emits the per-row hinge terms (triplet and background).
    """
    k = pl.program_id(1)
    nk = pl.num_programs(1)

    @pl.when(k == 0)
    def _init():
        ap_acc[...] = jnp.full_like(ap_acc, _NEG_FILL)
        an_acc[...] = jnp.full_like(an_acc, _POS_FILL)
        ap2_acc[...] = jnp.full_like(ap2_acc, _NEG_FILL)
        an2_acc[...] = jnp.full_like(an2_acc, _POS_FILL)

    x_r = x_row_ref[...]                              # (TM, Dp) f32
    x_c = x_col_ref[...]                              # (TK, Dp) f32
    # gram[i,j] = <x_i, x_j>   (MXU, f32 so hard-mining selection tracks the
    # PyTorch reference closely; bf16 inputs are a possible large-D speedup).
    gram = jax.lax.dot_general(x_r, x_c, (((1,), (1,)), ((), ())),
                               preferred_element_type=jnp.float32)  # (TM, TK)

    # Column-side vectors are resident whole in VMEM; take this step's row.
    sqn_k = sqn_col_ref[pl.ds(k, 1), :]               # (1, TK) f32  |x_j|^2
    t_row_k = t_row_ref[pl.ds(k, 1), :]               # (1, TK) i32  labels
    e = sqn_k - 2.0 * gram                            # d2[i,j] = |x_i|^2 + e[i,j]

    t_col = t_col_ref[...]                            # (TM, 1) i32 labels
    fg_col = t_col >= 0                               # (TM, 1) bool

    ap = ap_acc[...]
    an = an_acc[...]
    ap2 = ap2_acc[...]
    an2 = an2_acc[...]
    for g in range(tk // 128):                        # static lane-group fold
        lo = g * 128
        eg = e[:, lo:lo + 128]                        # (TM, 128)
        trg = t_row_k[:, lo:lo + 128]                 # (1, 128)
        fg_row = trg >= 0
        bg_row = jnp.logical_and(trg < 0, trg != _PAD_LABEL)   # real bg only
        fg_pair = jnp.logical_and(fg_col, fg_row)     # both foreground
        same = t_col == trg                           # same label
        pos_m = jnp.logical_and(fg_pair, same)
        neg_m = jnp.logical_and(fg_pair, jnp.logical_not(same))
        bg_m = jnp.logical_and(fg_col, bg_row)        # fg row, bg column
        ap = jnp.maximum(ap, jnp.where(pos_m, eg, _NEG_FILL))     # hardest positive
        ap2 = jnp.maximum(ap2, jnp.where(fg_pair, eg, _NEG_FILL))  # farthest fg
        an = jnp.minimum(an, jnp.where(neg_m, eg, _POS_FILL))     # hardest negative
        an2 = jnp.minimum(an2, jnp.where(bg_m, eg, _POS_FILL))    # nearest background
    ap_acc[...] = ap
    an_acc[...] = an
    ap2_acc[...] = ap2
    an2_acc[...] = an2

    @pl.when(k == nk - 1)
    def _finalize():
        sq_i = sqn_row_ref[...]                       # (TM, 1) f32 |x_i|^2

        def to_dist(v):   # deferred clamp + sqrt on reduced (TM,1) vectors only
            return jnp.sqrt(jnp.clip(sq_i + v, 1e-12, _POS_FILL))

        d_ap = to_dist(jnp.max(ap_acc[...], axis=1, keepdims=True))
        d_an = to_dist(jnp.min(an_acc[...], axis=1, keepdims=True))
        d_ap2 = to_dist(jnp.max(ap2_acc[...], axis=1, keepdims=True))
        d_an2 = to_dist(jnp.min(an2_acc[...], axis=1, keepdims=True))
        h1_ref[...] = jnp.maximum(d_ap - d_an + margin, 0.0)    # triplet hinge
        h2_ref[...] = jnp.maximum(d_ap2 - d_an2 + margin, 0.0)  # background hinge


def _round_up(v, m):
    return ((v + m - 1) // m) * m


def quaduplet2_loss(inputs, targets, margin=0.3, bg_weight=0.25):
    """JAX/Pallas equivalent of Quaduplet2Loss.forward(inputs, targets)."""
    B, D = inputs.shape
    Dp = max(128, _round_up(D, 128))
    # Column tiles are multiples of 128 (lane-group fold); the row axis always
    # gets an even number (>=2) of blocks so v7x's two TensorCores both work.
    if B <= 128:
        Bp, TM, TK = 128, 64, 128
    else:
        Bp = _round_up(B, 256)
        TK = 256
        TM = 256 if (Bp // 256) % 2 == 0 else 128

    x = jnp.zeros((Bp, Dp), jnp.float32).at[:B, :D].set(inputs.astype(jnp.float32))
    # int32 labels -> exact equality for the whole int32 range (no 2^24 caveat).
    t = jnp.full((Bp,), _PAD_LABEL, jnp.int32).at[:B].set(targets.astype(jnp.int32))
    sqn = jnp.sum(x * x, axis=1)                      # (Bp,) squared norms

    nk = Bp // TK
    grid = (Bp // TM, nk)

    # Scoped-VMEM estimate: double-buffered x tiles + (TM,TK) gram/e/select
    # temporaries + (TM,128) accumulators + small vectors.  Cap at 40 MiB
    # (~62% of v7x's 64 MiB per-TC VMEM; harmless on v5e/v6e's 128 MiB).
    need = 4 * (2 * TM * Dp + 2 * TK * Dp + 8 * TM * TK
                + 4 * TM * 128 + 4 * Bp + 8 * TM)
    cp_kwargs = dict(dimension_semantics=("parallel", "arbitrary"))
    if need > 16 * 1024 * 1024:
        cp_kwargs["vmem_limit_bytes"] = min(need + (4 << 20), 40 * 1024 * 1024)

    kernel = functools.partial(_quaduplet2_kernel, margin=float(margin), tk=TK)
    h1, h2 = pl.pallas_call(
        kernel,
        out_shape=(jax.ShapeDtypeStruct((Bp, 1), jnp.float32),
                   jax.ShapeDtypeStruct((Bp, 1), jnp.float32)),
        grid_spec=pltpu.PrefetchScalarGridSpec(
            num_scalar_prefetch=0,
            grid=grid,
            in_specs=[
                pl.BlockSpec((TM, Dp), lambda i, k: (i, 0)),   # row tile of x
                pl.BlockSpec((TK, Dp), lambda i, k: (k, 0)),   # column tile of x (streamed)
                pl.BlockSpec((TM, 1), lambda i, k: (i, 0)),    # |x_i|^2 row norms
                pl.BlockSpec((nk, TK), lambda i, k: (0, 0)),   # |x_j|^2, whole array resident
                pl.BlockSpec((TM, 1), lambda i, k: (i, 0)),    # labels, column form
                pl.BlockSpec((nk, TK), lambda i, k: (0, 0)),   # labels, whole array resident
            ],
            out_specs=(
                pl.BlockSpec((TM, 1), lambda i, k: (i, 0)),
                pl.BlockSpec((TM, 1), lambda i, k: (i, 0)),
            ),
            scratch_shapes=[pltpu.VMEM((TM, 128), jnp.float32)] * 4,
        ),
        compiler_params=pltpu.CompilerParams(**cp_kwargs),
    )(x, x, sqn.reshape(Bp, 1), sqn.reshape(nk, TK),
      t.reshape(Bp, 1), t.reshape(nk, TK))

    # ---- O(B) epilogue in plain XLA (masked means, distinct-label gate) ----
    fg = targets >= 0
    n_fg = jnp.sum(fg.astype(jnp.float32))
    denom = jnp.maximum(n_fg, 1.0)                    # guard against 0-fg NaN
    h1v = h1[:B, 0]
    h2v = h2[:B, 0]
    loss_trip = jnp.sum(jnp.where(fg, h1v, 0.0)) / denom
    loss_bg = jnp.sum(jnp.where(fg, h2v, 0.0)) / denom
    # No-background case: PyTorch would hit an undefined loss_bg; we contribute 0.
    has_bg = jnp.any(targets < 0)
    total = loss_trip + bg_weight * jnp.where(has_bg, loss_bg, 0.0)

    # Distinct-foreground-label count (the module's "< 2 labels -> return 0").
    same = (targets[:, None] == targets[None, :]) & fg[:, None] & fg[None, :]
    idx = jnp.arange(B)
    earlier = jnp.any(same & (idx[None, :] < idx[:, None]), axis=1)
    n_distinct = jnp.sum((fg & jnp.logical_not(earlier)).astype(jnp.int32))
    return jnp.where(n_distinct >= 2, total, jnp.float32(0.0))


def _reference_numpy(inputs, targets, margin=0.3, bg_weight=0.25):
    """Pure numpy transliteration of the PyTorch forward (for validation)."""
    inputs = np.asarray(inputs, np.float64)
    targets = np.asarray(targets)
    fg_x = inputs[targets >= 0]
    labels = targets[targets >= 0]
    bg_x = inputs[targets < 0]
    if len(set(labels.tolist())) < 2:
        return np.float32(0.0)
    n = fg_x.shape[0]
    sq = (fg_x ** 2).sum(1, keepdims=True)
    dist = np.sqrt(np.clip(sq + sq.T - 2.0 * fg_x @ fg_x.T, 1e-12, None))
    mask = labels[:, None] == labels[None, :]
    dist_ap = np.array([dist[i][mask[i]].max() for i in range(n)])
    dist_an = np.array([dist[i][~mask[i]].min() for i in range(n)])
    loss = np.maximum(dist_ap - dist_an + margin, 0.0).mean()
    sq_bg = (bg_x ** 2).sum(1, keepdims=True)
    dist_new = np.sqrt(np.clip(sq + sq_bg.T - 2.0 * fg_x @ bg_x.T, 1e-12, None))
    loss_bg = np.maximum(dist.max(1) - dist_new.min(1) + margin, 0.0).mean()
    return np.float32(loss + bg_weight * loss_bg)


if __name__ == "__main__":
    key = jax.random.PRNGKey(0)
    B, D = 16, 32
    inputs = jax.random.normal(key, (B, D), dtype=jnp.float32)
    # labels: several identity classes plus background (-1) samples
    targets = jnp.array([0, 0, 1, 1, 2, 2, -1, -1, 3, 3, 0, 1, -1, 2, 3, -1],
                        dtype=jnp.int32)

    loss = quaduplet2_loss(inputs, targets, margin=0.3, bg_weight=0.25)
    loss = jax.block_until_ready(loss)

    ref = _reference_numpy(np.asarray(inputs), np.asarray(targets),
                           margin=0.3, bg_weight=0.25)
    assert np.isfinite(float(loss)), "kernel produced non-finite loss"
    assert abs(float(loss) - float(ref)) < 2e-3, (float(loss), float(ref))

    # degenerate case: fewer than 2 distinct foreground labels -> 0
    t2 = jnp.array([5] * 8 + [-1] * 8, dtype=jnp.int32)
    loss2 = jax.block_until_ready(quaduplet2_loss(inputs, t2))
    assert abs(float(loss2)) < 1e-6, float(loss2)

    print("KERNEL_OK")
</pallas_src>

<mosaic_0001>
module attributes {stable_mosaic.version = 11 : i64} {
  func.func @_quaduplet2_kernel(%arg0: i32, %arg1: i32, %arg2: memref<64x128xf32, #tpu.memory_space<vmem>>, %arg3: memref<128x128xf32, #tpu.memory_space<vmem>>, %arg4: memref<64x1xf32, #tpu.memory_space<vmem>>, %arg5: memref<1x128xf32, #tpu.memory_space<vmem>>, %arg6: memref<64x1xi32, #tpu.memory_space<vmem>>, %arg7: memref<1x128xi32, #tpu.memory_space<vmem>>, %arg8: memref<64x1xf32, #tpu.memory_space<vmem>>, %arg9: memref<64x1xf32, #tpu.memory_space<vmem>>, %arg10: memref<64x128xf32, #tpu.memory_space<vmem>>, %arg11: memref<64x128xf32, #tpu.memory_space<vmem>>, %arg12: memref<64x128xf32, #tpu.memory_space<vmem>>, %arg13: memref<64x128xf32, #tpu.memory_space<vmem>>) attributes {dimension_semantics = [#tpu.dimension_semantics<parallel>, #tpu.dimension_semantics<arbitrary>], iteration_bounds = array<i64: 2, 1>, scalar_prefetch = 0 : i64, scratch_operands = 4 : i64, tpu.core_type = #tpu.core_type<tc>, window_params = [{transform_indices = @transform_0, window_bounds = array<i64: 64, 128>}, {transform_indices = @transform_1, window_bounds = array<i64: 128, 128>}, {transform_indices = @transform_2, window_bounds = array<i64: 64, 1>}, {pipeline_mode = #tpu.pipeline_mode<synchronous>, transform_indices = @transform_3, window_bounds = array<i64: 1, 128>}, {transform_indices = @transform_4, window_bounds = array<i64: 64, 1>}, {pipeline_mode = #tpu.pipeline_mode<synchronous>, transform_indices = @transform_5, window_bounds = array<i64: 1, 128>}, {transform_indices = @transform_6, window_bounds = array<i64: 64, 1>}, {transform_indices = @transform_7, window_bounds = array<i64: 64, 1>}]} {
    %c0_i32 = arith.constant 0 : i32
    %0 = arith.cmpi eq, %arg1, %c0_i32 : i32
    %1 = arith.extui %0 : i1 to i32
    %c0_i32_0 = arith.constant 0 : i32
    %2 = arith.cmpi ne, %1, %c0_i32_0 : i32
    scf.if %2 {
      %cst_35 = arith.constant -3.000000e+38 : f32
      %59 = vector.broadcast %cst_35 : f32 to vector<64x128xf32>
      %c0_36 = arith.constant 0 : index
      %c0_37 = arith.constant 0 : index
      %60 = vector.load %arg10[%c0_36, %c0_37] : memref<64x128xf32, #tpu.memory_space<vmem>>, vector<64x128xf32>
      tpu.vector_store %arg10[%c0_36, %c0_37], %59 {strides = array<i32>} : memref<64x128xf32, #tpu.memory_space<vmem>>, vector<64x128xf32>,
      %cst_38 = arith.constant 3.000000e+38 : f32
      %61 = vector.broadcast %cst_38 : f32 to vector<64x128xf32>
      %c0_39 = arith.constant 0 : index
      %c0_40 = arith.constant 0 : index
      %62 = vector.load %arg11[%c0_39, %c0_40] : memref<64x128xf32, #tpu.memory_space<vmem>>, vector<64x128xf32>
      tpu.vector_store %arg11[%c0_39, %c0_40], %61 {strides = array<i32>} : memref<64x128xf32, #tpu.memory_space<vmem>>, vector<64x128xf32>,
      %cst_41 = arith.constant -3.000000e+38 : f32
      %63 = vector.broadcast %cst_41 : f32 to vector<64x128xf32>
      %c0_42 = arith.constant 0 : index
      %c0_43 = arith.constant 0 : index
      %64 = vector.load %arg12[%c0_42, %c0_43] : memref<64x128xf32, #tpu.memory_space<vmem>>, vector<64x128xf32>
      tpu.vector_store %arg12[%c0_42, %c0_43], %63 {strides = array<i32>} : memref<64x128xf32, #tpu.memory_space<vmem>>, vector<64x128xf32>,
      %cst_44 = arith.constant 3.000000e+38 : f32
      %65 = vector.broadcast %cst_44 : f32 to vector<64x128xf32>
      %c0_45 = arith.constant 0 : index
      %c0_46 = arith.constant 0 : index
      %66 = vector.load %arg13[%c0_45, %c0_46] : memref<64x128xf32, #tpu.memory_space<vmem>>, vector<64x128xf32>
      tpu.vector_store %arg13[%c0_45, %c0_46], %65 {strides = array<i32>} : memref<64x128xf32, #tpu.memory_space<vmem>>, vector<64x128xf32>,
    } else {
    }
    %c0 = arith.constant 0 : index
    %c0_1 = arith.constant 0 : index
    %3 = vector.load %arg2[%c0, %c0_1] : memref<64x128xf32, #tpu.memory_space<vmem>>, vector<64x128xf32>
    %c0_2 = arith.constant 0 : index
    %c0_3 = arith.constant 0 : index
    %4 = vector.load %arg3[%c0_2, %c0_3] : memref<128x128xf32, #tpu.memory_space<vmem>>, vector<128x128xf32>
    %cst = arith.constant dense<0.000000e+00> : vector<64x128xf32>
    %5 = tpu.matmul %3, %4, %cst {dimension_numbers = #tpu.dot_dimension_numbers<[1], [1], [0], [0], [0, 0, 1, 0], [], []>} : vector<64x128xf32>, vector<128x128xf32>, vector<64x128xf32> -> vector<64x128xf32>
    %6 = arith.index_cast %arg1 : i32 to index
    %c0_4 = arith.constant 0 : index
    %7 = vector.load %arg5[%6, %c0_4] : memref<1x128xf32, #tpu.memory_space<vmem>>, vector<1x128xf32>
    %8 = arith.index_cast %arg1 : i32 to index
    %c0_5 = arith.constant 0 : index
    %9 = vector.load %arg7[%8, %c0_5] : memref<1x128xi32, #tpu.memory_space<vmem>>, vector<1x128xi32>
    %cst_6 = arith.constant 2.000000e+00 : f32
    %10 = vector.broadcast %cst_6 : f32 to vector<64x128xf32>
    %11 = arith.mulf %10, %5 : vector<64x128xf32>
    %12 = vector.broadcast %7 : vector<1x128xf32> to vector<64x128xf32>
    %13 = arith.subf %12, %11 : vector<64x128xf32>
    %c0_7 = arith.constant 0 : index
    %c0_8 = arith.constant 0 : index
    %14 = vector.load %arg6[%c0_7, %c0_8] : memref<64x1xi32, #tpu.memory_space<vmem>>, vector<64x1xi32>
    %c0_i32_9 = arith.constant 0 : i32
    %15 = vector.broadcast %c0_i32_9 : i32 to vector<64x1xi32>
    %16 = arith.cmpi sge, %14, %15 : vector<64x1xi32>
    %c0_10 = arith.constant 0 : index
    %c0_11 = arith.constant 0 : index
    %17 = vector.load %arg10[%c0_10, %c0_11] : memref<64x128xf32, #tpu.memory_space<vmem>>, vector<64x128xf32>
    %c0_12 = arith.constant 0 : index
    %c0_13 = arith.constant 0 : index
    %18 = vector.load %arg11[%c0_12, %c0_13] : memref<64x128xf32, #tpu.memory_space<vmem>>, vector<64x128xf32>
    %c0_14 = arith.constant 0 : index
    %c0_15 = arith.constant 0 : index
    %19 = vector.load %arg12[%c0_14, %c0_15] : memref<64x128xf32, #tpu.memory_space<vmem>>, vector<64x128xf32>
    %c0_16 = arith.constant 0 : index
    %c0_17 = arith.constant 0 : index
    %20 = vector.load %arg13[%c0_16, %c0_17] : memref<64x128xf32, #tpu.memory_space<vmem>>, vector<64x128xf32>
    %c0_i32_18 = arith.constant 0 : i32
    %21 = vector.broadcast %c0_i32_18 : i32 to vector<1x128xi32>
    %22 = arith.cmpi sge, %9, %21 : vector<1x128xi32>
    %c0_i32_19 = arith.constant 0 : i32
    %23 = vector.broadcast %c0_i32_19 : i32 to vector<1x128xi32>
    %24 = arith.cmpi slt, %9, %23 : vector<1x128xi32>
    %c-1073741824_i32 = arith.constant -1073741824 : i32
    %25 = vector.broadcast %c-1073741824_i32 : i32 to vector<1x128xi32>
    %26 = arith.cmpi ne, %9, %25 : vector<1x128xi32>
    %27 = arith.andi %24, %26 : vector<1x128xi1>
    %28 = vector.broadcast %16 : vector<64x1xi1> to vector<64x128xi1>
    %29 = vector.broadcast %22 : vector<1x128xi1> to vector<64x128xi1>
    %30 = arith.andi %28, %29 : vector<64x128xi1>
    %31 = vector.broadcast %14 : vector<64x1xi32> to vector<64x128xi32>
    %32 = vector.broadcast %9 : vector<1x128xi32> to vector<64x128xi32>
    %33 = arith.cmpi eq, %31, %32 : vector<64x128xi32>
    %34 = arith.andi %30, %33 : vector<64x128xi1>
    %cst_20 = arith.constant dense<true> : vector<64x128xi1>
    %35 = arith.xori %33, %cst_20 : vector<64x128xi1>
    %36 = arith.andi %30, %35 : vector<64x128xi1>
    %37 = vector.broadcast %16 : vector<64x1xi1> to vector<64x128xi1>
    %38 = vector.broadcast %27 : vector<1x128xi1> to vector<64x128xi1>
    %39 = arith.andi %37, %38 : vector<64x128xi1>
    %cst_21 = arith.constant -3.000000e+38 : f32
    %40 = vector.broadcast %cst_21 : f32 to vector<64x128xf32>
    %41 = arith.select %34, %13, %40 : vector<64x128xi1>, vector<64x128xf32>
    %42 = arith.maximumf %17, %41 : vector<64x128xf32>
    %cst_22 = arith.constant -3.000000e+38 : f32
    %43 = vector.broadcast %cst_22 : f32 to vector<64x128xf32>
    %44 = arith.select %30, %13, %43 : vector<64x128xi1>, vector<64x128xf32>
    %45 = arith.maximumf %19, %44 : vector<64x128xf32>
    %cst_23 = arith.constant 3.000000e+38 : f32
    %46 = vector.broadcast %cst_23 : f32 to vector<64x128xf32>
    %47 = arith.select %36, %13, %46 : vector<64x128xi1>, vector<64x128xf32>
    %48 = arith.minimumf %18, %47 : vector<64x128xf32>
    %cst_24 = arith.constant 3.000000e+38 : f32
    %49 = vector.broadcast %cst_24 : f32 to vector<64x128xf32>
    %50 = arith.select %39, %13, %49 : vector<64x128xi1>, vector<64x128xf32>
    %51 = arith.minimumf %20, %50 : vector<64x128xf32>
    %c0_25 = arith.constant 0 : index
    %c0_26 = arith.constant 0 : index
    %52 = vector.load %arg10[%c0_25, %c0_26] : memref<64x128xf32, #tpu.memory_space<vmem>>, vector<64x128xf32>
    tpu.vector_store %arg10[%c0_25, %c0_26], %42 {strides = array<i32>} : memref<64x128xf32, #tpu.memory_space<vmem>>, vector<64x128xf32>,
    %c0_27 = arith.constant 0 : index
    %c0_28 = arith.constant 0 : index
    %53 = vector.load %arg11[%c0_27, %c0_28] : memref<64x128xf32, #tpu.memory_space<vmem>>, vector<64x128xf32>
    tpu.vector_store %arg11[%c0_27, %c0_28], %48 {strides = array<i32>} : memref<64x128xf32, #tpu.memory_space<vmem>>, vector<64x128xf32>,
    %c0_29 = arith.constant 0 : index
    %c0_30 = arith.constant 0 : index
    %54 = vector.load %arg12[%c0_29, %c0_30] : memref<64x128xf32, #tpu.memory_space<vmem>>, vector<64x128xf32>
    tpu.vector_store %arg12[%c0_29, %c0_30], %45 {strides = array<i32>} : memref<64x128xf32, #tpu.memory_space<vmem>>, vector<64x128xf32>,
    %c0_31 = arith.constant 0 : index
    %c0_32 = arith.constant 0 : index
    %55 = vector.load %arg13[%c0_31, %c0_32] : memref<64x128xf32, #tpu.memory_space<vmem>>, vector<64x128xf32>
    tpu.vector_store %arg13[%c0_31, %c0_32], %51 {strides = array<i32>} : memref<64x128xf32, #tpu.memory_space<vmem>>, vector<64x128xf32>,
    %c0_i32_33 = arith.constant 0 : i32
    %56 = arith.cmpi eq, %arg1, %c0_i32_33 : i32
    %57 = arith.extui %56 : i1 to i32
    %c0_i32_34 = arith.constant 0 : i32
    %58 = arith.cmpi ne, %57, %c0_i32_34 : i32
    scf.if %58 {
      %c0_35 = arith.constant 0 : index
      %c0_36 = arith.constant 0 : index
      %59 = vector.load %arg4[%c0_35, %c0_36] : memref<64x1xf32, #tpu.memory_space<vmem>>, vector<64x1xf32>
      %c0_37 = arith.constant 0 : index
      %c0_38 = arith.constant 0 : index
      %60 = vector.load %arg10[%c0_37, %c0_38] : memref<64x128xf32, #tpu.memory_space<vmem>>, vector<64x128xf32>
      %cst_39 = arith.constant dense<0xFF800000> : vector<64xf32>
      %61 = vector.multi_reduction <maximumf>, %60, %cst_39 [1] : vector<64x128xf32> to vector<64xf32>
      %62 = vector.shape_cast %61 : vector<64xf32> to vector<64x1xf32>
      %63 = arith.addf %59, %62 : vector<64x1xf32>
      %cst_40 = arith.constant 9.99999996E-13 : f32
      %cst_41 = arith.constant 3.000000e+38 : f32
      %64 = vector.broadcast %cst_40 : f32 to vector<64x1xf32>
      %65 = arith.maximumf %64, %63 : vector<64x1xf32>
      %66 = vector.broadcast %cst_41 : f32 to vector<64x1xf32>
      %67 = arith.minimumf %66, %65 : vector<64x1xf32>
      %68 = math.sqrt %67 : vector<64x1xf32>
      %c0_42 = arith.constant 0 : index
      %c0_43 = arith.constant 0 : index
      %69 = vector.load %arg11[%c0_42, %c0_43] : memref<64x128xf32, #tpu.memory_space<vmem>>, vector<64x128xf32>
      %cst_44 = arith.constant dense<0x7F800000> : vector<64xf32>
      %70 = vector.multi_reduction <minimumf>, %69, %cst_44 [1] : vector<64x128xf32> to vector<64xf32>
      %71 = vector.shape_cast %70 : vector<64xf32> to vector<64x1xf32>
      %72 = arith.addf %59, %71 : vector<64x1xf32>
      %cst_45 = arith.constant 9.99999996E-13 : f32
      %cst_46 = arith.constant 3.000000e+38 : f32
      %73 = vector.broadcast %cst_45 : f32 to vector<64x1xf32>
      %74 = arith.maximumf %73, %72 : vector<64x1xf32>
      %75 = vector.broadcast %cst_46 : f32 to vector<64x1xf32>
      %76 = arith.minimumf %75, %74 : vector<64x1xf32>
      %77 = math.sqrt %76 : vector<64x1xf32>
      %c0_47 = arith.constant 0 : index
      %c0_48 = arith.constant 0 : index
      %78 = vector.load %arg12[%c0_47, %c0_48] : memref<64x128xf32, #tpu.memory_space<vmem>>, vector<64x128xf32>
      %cst_49 = arith.constant dense<0xFF800000> : vector<64xf32>
      %79 = vector.multi_reduction <maximumf>, %78, %cst_49 [1] : vector<64x128xf32> to vector<64xf32>
      %80 = vector.shape_cast %79 : vector<64xf32> to vector<64x1xf32>
      %81 = arith.addf %59, %80 : vector<64x1xf32>
      %cst_50 = arith.constant 9.99999996E-13 : f32
      %cst_51 = arith.constant 3.000000e+38 : f32
      %82 = vector.broadcast %cst_50 : f32 to vector<64x1xf32>
      %83 = arith.maximumf %82, %81 : vector<64x1xf32>
      %84 = vector.broadcast %cst_51 : f32 to vector<64x1xf32>
      %85 = arith.minimumf %84, %83 : vector<64x1xf32>
      %86 = math.sqrt %85 : vector<64x1xf32>
      %c0_52 = arith.constant 0 : index
      %c0_53 = arith.constant 0 : index
      %87 = vector.load %arg13[%c0_52, %c0_53] : memref<64x128xf32, #tpu.memory_space<vmem>>, vector<64x128xf32>
      %cst_54 = arith.constant dense<0x7F800000> : vector<64xf32>
      %88 = vector.multi_reduction <minimumf>, %87, %cst_54 [1] : vector<64x128xf32> to vector<64xf32>
      %89 = vector.shape_cast %88 : vector<64xf32> to vector<64x1xf32>
      %90 = arith.addf %59, %89 : vector<64x1xf32>
      %cst_55 = arith.constant 9.99999996E-13 : f32
      %cst_56 = arith.constant 3.000000e+38 : f32
      %91 = vector.broadcast %cst_55 : f32 to vector<64x1xf32>
      %92 = arith.maximumf %91, %90 : vector<64x1xf32>
      %93 = vector.broadcast %cst_56 : f32 to vector<64x1xf32>
      %94 = arith.minimumf %93, %92 : vector<64x1xf32>
      %95 = math.sqrt %94 : vector<64x1xf32>
      %96 = arith.subf %68, %77 : vector<64x1xf32>
      %cst_57 = arith.constant 3.000000e-01 : f32
      %97 = vector.broadcast %cst_57 : f32 to vector<64x1xf32>
      %98 = arith.addf %96, %97 : vector<64x1xf32>
      %cst_58 = arith.constant 0.000000e+00 : f32
      %99 = vector.broadcast %cst_58 : f32 to vector<64x1xf32>
      %100 = arith.maximumf %98, %99 : vector<64x1xf32>
      %c0_59 = arith.constant 0 : index
      %c0_60 = arith.constant 0 : index
      %101 = vector.load %arg8[%c0_59, %c0_60] : memref<64x1xf32, #tpu.memory_space<vmem>>, vector<64x1xf32>
      tpu.vector_store %arg8[%c0_59, %c0_60], %100 {strides = array<i32>} : memref<64x1xf32, #tpu.memory_space<vmem>>, vector<64x1xf32>,
      %102 = arith.subf %86, %95 : vector<64x1xf32>
      %cst_61 = arith.constant 3.000000e-01 : f32
      %103 = vector.broadcast %cst_61 : f32 to vector<64x1xf32>
      %104 = arith.addf %102, %103 : vector<64x1xf32>
      %cst_62 = arith.constant 0.000000e+00 : f32
      %105 = vector.broadcast %cst_62 : f32 to vector<64x1xf32>
      %106 = arith.maximumf %104, %105 : vector<64x1xf32>
      %c0_63 = arith.constant 0 : index
      %c0_64 = arith.constant 0 : index
      %107 = vector.load %arg9[%c0_63, %c0_64] : memref<64x1xf32, #tpu.memory_space<vmem>>, vector<64x1xf32>
      tpu.vector_store %arg9[%c0_63, %c0_64], %106 {strides = array<i32>} : memref<64x1xf32, #tpu.memory_space<vmem>>, vector<64x1xf32>,
    } else {
    }
    return
  }
  func.func @transform_0(%arg0: i32, %arg1: i32) -> (i32, i32) {
    %c0_i32 = arith.constant 0 : i32
    %c0_i32_0 = arith.constant 0 : i32
    return %arg0, %c0_i32 : i32, i32
  }
  func.func @transform_1(%arg0: i32, %arg1: i32) -> (i32, i32) {
    %c0_i32 = arith.constant 0 : i32
    %c0_i32_0 = arith.constant 0 : i32
    return %arg1, %c0_i32 : i32, i32
  }
  func.func @transform_2(%arg0: i32, %arg1: i32) -> (i32, i32) {
    %c0_i32 = arith.constant 0 : i32
    %c0_i32_0 = arith.constant 0 : i32
    return %arg0, %c0_i32 : i32, i32
  }
  func.func @transform_3(%arg0: i32, %arg1: i32) -> (i32, i32) {
    %c0_i32 = arith.constant 0 : i32
    %c0_i32_0 = arith.constant 0 : i32
    %c0_i32_1 = arith.constant 0 : i32
    return %c0_i32, %c0_i32_0 : i32, i32
  }
  func.func @transform_4(%arg0: i32, %arg1: i32) -> (i32, i32) {
    %c0_i32 = arith.constant 0 : i32
    %c0_i32_0 = arith.constant 0 : i32
    return %arg0, %c0_i32 : i32, i32
  }
  func.func @transform_5(%arg0: i32, %arg1: i32) -> (i32, i32) {
    %c0_i32 = arith.constant 0 : i32
    %c0_i32_0 = arith.constant 0 : i32
    %c0_i32_1 = arith.constant 0 : i32
    return %c0_i32, %c0_i32_0 : i32, i32
  }
  func.func @transform_6(%arg0: i32, %arg1: i32) -> (i32, i32) {
    %c0_i32 = arith.constant 0 : i32
    %c0_i32_0 = arith.constant 0 : i32
    return %arg0, %c0_i32 : i32, i32
  }
  func.func @transform_7(%arg0: i32, %arg1: i32) -> (i32, i32) {
    %c0_i32 = arith.constant 0 : i32
    %c0_i32_0 = arith.constant 0 : i32
    return %arg0, %c0_i32 : i32, i32
  }
}

</mosaic_0001>

<bundles_post_ra>
// kernel: tpu_custom_call.1
= control target key start
LH: loop header
LB: loop body
LE: loop exit
PB: predicated region body
PF: predicated region fallthrough
CT: control target
= control target key end

     0   :  { %s1766_s24 = smov 0   ;;  %s1768_s25 = smov 0   ;;  %s2763_s0 = inlined_call_operand.vmem [shape: f32[128,128], index: 0, kind: input, shape index: {}]   ;;  %s2764_s1 = inlined_call_operand.vmem [shape: f32[128,128], index: 1, kind: input, shape index: {}]   ;;  %s2765_s2 = inlined_call_operand.vmem [shape: f32[128,1], index: 2, kind: input, shape index: {}]   ;;  %s2766_s3 = inlined_call_operand.vmem [shape: f32[1,128], index: 3, kind: input, shape index: {}]   ;;  %s2767_s4 = inlined_call_operand.vmem [shape: s32[128,1], index: 4, kind: input, shape index: {}]   ;;  %s2768_s5 = inlined_call_operand.vmem [shape: s32[1,128], index: 5, kind: input, shape index: {}]   ;;  %s2769_s6 = inlined_call_operand.vmem [shape: f32[128,1], index: 6, kind: output, shape index: {0}]   ;;  %s2770_s7 = inlined_call_operand.vmem [shape: f32[128,1], index: 7, kind: output, shape index: {1}]  }
   0x1   :  { %s1770_s26 = smov 0  }
   0x2 LB: > { %s30_s27 = sadd.s32 1, %s1718_s25  ;;  %p1478_p0 = scmp.ge.s32.totalorder %s1722_s26, 1  ;;  %s1722_s26 = sphi %s1770_s26, %s18_s26   ;;  %s1718_s25 = sphi %s1768_s25, %s2885_s25   ;;  %s1714_s24 = sphi %s1766_s24, %s2884_s24  }
   0x3   : > { %p32_p1 = scmp.ge.s32.totalorder %s30_s27, 2  ;;  %p286_p2 = scmp.lt.s32.totalorder %s1722_s26, 3 }
   0x5   : > { %s2887_s27 = smov (%p32_p1, %s30_s27), 0  ;;  %p287_p3 = pnand %p1478_p0, %p286_p2 }
   0x6   : > { %v418_v0 = vld [vmem:[%s2764_s1] sm:$0xff] (!%p287_p3)  ;;  %v419_v1 = vld [vmem:[%s2764_s1 + $0x8] sm:$0xff] (!%p287_p3)  ;;  %v420_v2 = vld [vmem:[%s2764_s1 + $0x10] sm:$0xff] (!%p287_p3)  ;;  %s1479_s11 = sshll.u32 (!%p287_p3), %s1714_s24, 3  ;;  %v1724_v5 = vmov (!%p287_p3), 0   ;;  %v658_v54 = vlaneseq (!%p287_p3) }
   0x7   : > { %290 = sbr.rel (%p287_p3) target bundleno = 539 (0x21b), region = 44  ;;  %v1560_v3 = vpack.c.bf16 (!%p287_p3), %v419_v1, %v418_v0  ;;  %v421_v4 = vld [vmem:[%s2764_s1 + $0x18] sm:$0xff] (!%p287_p3)  ;;  %p339_p4 = scmp.lt.s32.totalorder (!%p287_p3), %s1479_s11, 15  ;;  %1635 = vset.pattern.permute.xlu1 (!%p287_p3), %v1724_v5  ;;  %1634 = vset.pattern.permute.xlu0 (!%p287_p3), %v1724_v5  ;;  %v422_v7 = vld [vmem:[%s2764_s1 + $0x20] sm:$0xff] (!%p287_p3)  ;;  %v423_v8 = vld [vmem:[%s2764_s1 + $0x28] sm:$0xff] (!%p287_p3) }
   0x8   : > { %v1564_v6 = vpack.c.bf16 (!%p287_p3), %v421_v4, %v420_v2  ;;  %v1568_v11 = vpack.c.bf16 (!%p287_p3), %v423_v8, %v422_v7  ;;  %v424_v20 = vld [vmem:[%s2764_s1 + $0x30] sm:$0xff] (!%p287_p3)  ;;  %v425_v21 = vld [vmem:[%s2764_s1 + $0x38] sm:$0xff] (!%p287_p3)  ;;  %v426_v29 = vld [vmem:[%s2764_s1 + $0x40] sm:$0xff] (!%p287_p3)  ;;  %v659_v58 = vshrl.u32 (!%p287_p3), %v658_v54, 7 }
   0x9   : > { %1561 = vmatprep.subr.bf16.mxu0 (!%p287_p3), %v1560_v3  ;;  %1592 = vmatprep.subr.bf16.mxu1 (!%p287_p3), %v1560_v3  ;;  %v1572_v24 = vpack.c.bf16 (!%p287_p3), %v425_v21, %v424_v20  ;;  %v427_v30 = vld [vmem:[%s2764_s1 + $0x48] sm:$0xff] (!%p287_p3)  ;;  %v428_v34 = vld [vmem:[%s2764_s1 + $0x50] sm:$0xff] (!%p287_p3)  ;;  %v429_v35 = vld [vmem:[%s2764_s1 + $0x58] sm:$0xff] (!%p287_p3) }
   0xa   : > { %1563 = vmatpush3.bf16.xpose.msra.mxu0 (!%p287_p3), %v1560_v3  ;;  %1600 = vmatpush3.bf16.xpose.msra.mxu1 (!%p287_p3), %v1560_v3  ;;  %v1576_v33 = vpack.c.bf16 (!%p287_p3), %v427_v30, %v426_v29  ;;  %v1580_v36 = vpack.c.bf16 (!%p287_p3), %v429_v35, %v428_v34  ;;  %v430_v37 = vld [vmem:[%s2764_s1 + $0x60] sm:$0xff] (!%p287_p3)  ;;  %v431_v38 = vld [vmem:[%s2764_s1 + $0x68] sm:$0xff] (!%p287_p3)  ;;  %v432_v40 = vld [vmem:[%s2764_s1 + $0x70] sm:$0xff] (!%p287_p3)  ;;  %v660_v59 = vsub.s32 (!%p287_p3), 0, %v659_v58 }
   0xb   : > { %1565 = vmatprep.subr.bf16.mxu0 (!%p287_p3), %v1564_v6  ;;  %1593 = vmatprep.subr.bf16.mxu1 (!%p287_p3), %v1564_v6  ;;  %v1584_v39 = vpack.c.bf16 (!%p287_p3), %v431_v38, %v430_v37  ;;  %v433_v41 = vld [vmem:[%s2764_s1 + $0x78] sm:$0xff] (!%p287_p3)  ;;  %v542_v56 = vld [vmem:[%s2768_s5] sm:$0x1] (!%p287_p3)  ;;  %v2821_v37 = vmov (!%p287_p3), 0 }
   0xc   : > { %v1588_v42 = vpack.c.bf16 (!%p287_p3), %v433_v41, %v432_v40  ;;  %vm613_vm8 = vcmp.ge.s32.totalorder (!%p287_p3), %v542_v56, 0  ;;  %vm614_vm9 = vcmp.lt.s32.totalorder (!%p287_p3), %v542_v56, 0  ;;  %vm615_vm10 = vcmp.ne.s32.totalorder (!%p287_p3), %v542_v56, 3221225472 }
   0xd   : > { %v657_v61 = vsel (!%p287_p3), %vm613_vm8, 1, %v1724_v5  ;;  %v1880_v0 = vrot.slane (!%p287_p3), %v542_v56, %v660_v59  ;;  %vm616_vm11 = vmand (!%p287_p3), %vm614_vm9, %vm615_vm10 }
   0xe   : > { %s2889_s11 = smov (!%p339_p4, %s1479_s11), 15  ;;  %v661_v63 = vrot.slane %v657_v61, %v660_v59  ;;  %v731_v4 = vsel %vm616_vm11, 1, %v1724_v5 }
   0xf   : > { %s1798_s14 = sshll.u32 %s2889_s11, 3 }
  0x10   : > { %s1810_s21 = scalar_lea.vmem %s2763_s0, %s1798_s14  ;;  %s360_s24 = scalar_lea.vmem %s2767_s4, %s1798_s14  ;;  %vm1886_vm12 = vcmp.eq.s32.totalorder %v661_v63, 1 }
  0x11   : > { %v410_v9 = vld [vmem:[%s1810_s21] sm:$0xff]  ;;  %v567_v12 = vld [vmem:[%s360_s24 + $0x10] sm:$0xff]  ;;  %v568_v13 = vld [vmem:[%s360_s24 + $0x18] sm:$0xff]  ;;  %s2326_s12 = scalar_lea.vmem %s2765_s2, %s1798_s14  ;;  %s2402_s16 = scalar_lea.vmem %s2769_s6, %s1798_s14 }
  0x12   : > { %v414_v10 = vld [vmem:[%s1810_s21 + $0x20] sm:$0xff]  ;;  %1548 = vmatprep.mubr.f32.mxu0 %v410_v9  ;;  %vm575_vm0 = vcmp.ge.s32.totalorder %v567_v12, 0  ;;  %v566_v16 = vld [vmem:[%s360_s24 + $0x8] sm:$0xff]  ;;  %1567 = vmatpush3.bf16.xpose.msra.mxu0 %v1564_v6  ;;  %vm576_vm2 = vcmp.ge.s32.totalorder %v568_v13, 0  ;;  %v572_v25 = vld [vmem:[%s360_s24 + $0x38] sm:$0xff]  ;;  %v735_v9 = vrot.slane %v731_v4, %v660_v59  ;;  %s2519_s19 = scalar_lea.vmem %s2770_s7, %s1798_s14 }
  0x13   : > { %1554 = vmatprep.mubr.f32.mxu1 %v414_v10  ;;  %v565_v14 = vld [vmem:[%s360_s24] sm:$0xff]  ;;  %v619_v15 = vsel %vm575_vm0, 1, %v1724_v5  ;;  %1601 = vmatpush3.bf16.xpose.msra.mxu1 %v1564_v6  ;;  %v570_v18 = vld [vmem:[%s360_s24 + $0x28] sm:$0xff]  ;;  %vm574_vm3 = vcmp.ge.s32.totalorder %v566_v16, 0  ;;  %v620_v22 = vsel %vm576_vm2, 1, %v1724_v5  ;;  %v571_v26 = vld [vmem:[%s360_s24 + $0x30] sm:$0xff] }
  0x14   : > { %vm573_vm1 = vcmp.ge.s32.totalorder %v565_v14, 0  ;;  %1569 = vmatprep.subr.bf16.mxu0 %v1568_v11  ;;  %1594 = vmatprep.subr.bf16.mxu1 %v1568_v11  ;;  %v569_v19 = vld [vmem:[%s360_s24 + $0x20] sm:$0xff]  ;;  %v618_v23 = vsel %vm574_vm3, 1, %v1724_v5  ;;  %vm578_vm4 = vcmp.ge.s32.totalorder %v570_v18, 0  ;;  %vm580_vm6 = vcmp.ge.s32.totalorder %v572_v25, 0  ;;  %v411_v43 = vld [vmem:[%s1810_s21 + $0x8] sm:$0xff] }
  0x15   : > { %v617_v17 = vsel %vm573_vm1, 1, %v1724_v5  ;;  %632 = vperm.xlu1 %1635, %v619_v15   ;;  %vm577_vm5 = vcmp.ge.s32.totalorder %v569_v19, 0  ;;  %v622_v27 = vsel %vm578_vm4, 1, %v1724_v5  ;;  %vm579_vm7 = vcmp.ge.s32.totalorder %v571_v26, 0  ;;  %v415_v44 = vld [vmem:[%s1810_s21 + $0x28] sm:$0xff]  ;;  %v412_v45 = vld [vmem:[%s1810_s21 + $0x10] sm:$0xff] }
  0x16   : > { %626 = vperm.xlu0 %1634, %v617_v17   ;;  %v621_v28 = vsel %vm577_vm5, 1, %v1724_v5  ;;  %v624_v31 = vsel %vm580_vm6, 1, %v1724_v5  ;;  %v623_v32 = vsel %vm579_vm7, 1, %v1724_v5  ;;  %v416_v46 = vld [vmem:[%s1810_s21 + $0x30] sm:$0xff]  ;;  %v413_v47 = vld [vmem:[%s1810_s21 + $0x18] sm:$0xff]  ;;  %vm2780_vm6 = vmmov 1  }
  0x17   : > { %v417_v48 = vld [vmem:[%s1810_s21 + $0x38] sm:$0xff]  ;;  %v2329_v5 = vld [vmem:[%s2326_s12 + $0x28] sm:$0xff] }
  0x19   : > { %635 = vperm.xlu1 %1635, %v620_v22   ;;  %v2805_v22 = vmov 0 }
  0x1a   : > { %629 = vperm.xlu0 %1634, %v618_v23   ;;  %1571 = vmatpush3.bf16.xpose.msra.mxu0 %v1568_v11  ;;  %v2807_v23 = vmov 0 }
  0x1b   : > { %1602 = vmatpush3.bf16.xpose.msra.mxu1 %v1568_v11  ;;  %1573 = vmatprep.subr.bf16.mxu0 %v1572_v24 }
  0x1c   : > { %1595 = vmatprep.subr.bf16.mxu1 %v1572_v24 }
  0x1d   : > { %641 = vperm.xlu1 %1635, %v622_v27  }
  0x1e   : > { %638 = vperm.xlu0 %1634, %v621_v28  }
  0x21   : > { %647 = vperm.xlu1 %1635, %v624_v31  }
  0x22   : > { %644 = vperm.xlu0 %1634, %v623_v32   ;;  %1575 = vmatpush3.bf16.xpose.msra.mxu0 %v1572_v24  ;;  %v2814_v32 = vmov 0 }
  0x23   : > { %1603 = vmatpush3.bf16.xpose.msra.mxu1 %v1572_v24  ;;  %1577 = vmatprep.subr.bf16.mxu0 %v1576_v33  ;;  %v2809_v24 = vmov 0 }
  0x24   : > { %1596 = vmatprep.subr.bf16.mxu1 %v1576_v33 }
  0x25   : > { %675 = vperm.xlu1 %1635, %v566_v16   ;;  %v1959_v16 = vld [vmem:[%s2766_s3] ss:$0 sm:$0xff] }
  0x26   : > { %672 = vperm.xlu0 %1634, %v565_v14  }
  0x29   : > { %681 = vperm.xlu1 %1635, %v568_v13   ;;  %v2801_v13 = vmov 0 }
  0x2a   : > { %678 = vperm.xlu0 %1634, %v567_v12   ;;  %1579 = vmatpush3.bf16.xpose.msra.mxu0 %v1576_v33 }
  0x2b   : > { %1604 = vmatpush3.bf16.xpose.msra.mxu1 %v1576_v33  ;;  %1581 = vmatprep.subr.bf16.mxu0 %v1580_v36  ;;  %v2817_v33 = vmov 0 }
  0x2c   : > { %1597 = vmatprep.subr.bf16.mxu1 %v1580_v36 }
  0x2d   : > { %687 = vperm.xlu1 %1635, %v570_v18  }
  0x2e   : > { %684 = vperm.xlu0 %1634, %v569_v19  }
  0x31   : > { %693 = vperm.xlu1 %1635, %v572_v25  }
  0x32   : > { %690 = vperm.xlu0 %1634, %v571_v26   ;;  %1583 = vmatpush3.bf16.xpose.msra.mxu0 %v1580_v36 }
  0x33   : > { %1605 = vmatpush3.bf16.xpose.msra.mxu1 %v1580_v36  ;;  %1585 = vmatprep.subr.bf16.mxu0 %v1584_v39 }
  0x34   : > { %1598 = vmatprep.subr.bf16.mxu1 %v1584_v39 }
  0x3a   : > { %1587 = vmatpush3.bf16.xpose.msra.mxu0 %v1584_v39 }
  0x3b   : > { %1606 = vmatpush3.bf16.xpose.msra.mxu1 %v1584_v39  ;;  %1589 = vmatprep.subr.bf16.mxu0 %v1588_v42 }
  0x3c   : > { %1599 = vmatprep.subr.bf16.mxu1 %v1588_v42 }
  0x42   : > { %1591 = vmatpush3.bf16.xpose.msra.mxu0 %v1588_v42 }
  0x43   : > { %1607 = vmatpush3.bf16.xpose.msra.mxu1 %v1588_v42 }
  0x49   : > { %1549 = vmatmul.mubr.f32.vlgmr.msra.gmra.mrb[0].mxu0 %v411_v43  ;;  %v2827_v43 = vmov 0 }
  0x4a   : > { %1555 = vmatmul.mubr.f32.vlgmr.msra.gmra.mrb[0].mxu1 %v415_v44  ;;  %1551 = vmatprep.mubr.f32.mxu0 %v412_v45 }
  0x4b   : > { %1557 = vmatprep.mubr.f32.mxu1 %v416_v46 }
  0x4d   : > { %1552 = vmatmul.mubr.f32.gmra.mrb[2].mxu0 %v413_v47  ;;  %v2833_v47 = vmov 0 }
  0x4e   : > { %1558 = vmatmul.mubr.f32.gmra.mrb[2].mxu1 %v417_v48 }
  0x94   : > { %v1862_v49 = vpop.permute.xlu1 %632 }
  0x95   : > { %v1866_v51 = vpop.permute.xlu0 %626 }
  0x96   : > { %vm2771_vm13 = vcmp.eq.s32.totalorder %v1866_v51, 1 }
  0x97   : > { %vm1898_vm1 = vmand %vm2771_vm13, %vm1886_vm12 }
  0x98   : > { %v1864_v50 = vpop.permute.xlu1 %635 }
  0x99   : > { %v630_v53 = vpop.permute.xlu0 %629  ;;  %vm2773_vm4 = vcmp.eq.s32.totalorder %v1864_v50, 1 }
  0x9a   : > { %vm2775_vm14 = vcmp.eq.s32.totalorder %v630_v53, 1  ;;  %vm1942_vm11 = vmand %vm2773_vm4, %vm1886_vm12 }
  0x9b   : > { %vm1905_vm2 = vmand %vm2775_vm14, %vm1886_vm12  ;;  %v2802_v13 = vsel %vm1942_vm11, 4294967295, %v2801_v13 }
  0x9c   : > { %v1868_v52 = vpop.permute.xlu1 %641 }
  0x9d   : > { %v1875_v57 = vpop.permute.xlu0 %638  ;;  %vm2774_vm15 = vcmp.eq.s32.totalorder %v1868_v52, 1 }
  0x9e   : > { %vm2772_vm3 = vcmp.eq.s32.totalorder %v1875_v57, 1  ;;  %vm1915_vm5 = vmand %vm2774_vm15, %vm1886_vm12  ;;  %vm1966_vm15 = vcmp.eq.s32.totalorder %v735_v9, 1 }
  0x9f   : > { %vm1933_vm9 = vmand %vm2772_vm3, %vm1886_vm12  ;;  %v2806_v22 = vsel %vm1966_vm15, 4294967295, %v2805_v22 }
  0xa0   : > { %v1870_v55 = vpop.permute.xlu1 %647 }
  0xa1   : > { %v1878_v62 = vpop.permute.xlu0 %644  ;;  %vm2776_vm8 = vcmp.eq.s32.totalorder %v1870_v55, 1 }
  0xa2   : > { %vm1974_vm14 = vmand %vm2776_vm8, %vm1886_vm12 }
  0xa3   : > { %v2808_v23 = vsel %vm1974_vm14, 4294967295, %v2807_v23  ;;  %vm2813_vm14 = vcmp.eq.s32.totalorder %v630_v53, 1 }
  0xa4   : > { %v676_v60 = vpop.permute.xlu1 %675  ;;  %vm2006_vm11 = vmand %vm2813_vm14, %vm1966_vm15  ;;  %vm2820_vm14 = vcmp.eq.s32.totalorder %v1868_v52, 1 }
  0xa5   : > { %v1884_v2 = vpop.permute.xlu0 %672  ;;  %vm700_vm0 = vcmp.eq.s32.totalorder %v676_v60, %v1880_v0  ;;  %v2815_v32 = vsel %vm2006_vm11, 4294967295, %v2814_v32  ;;  %vm2029_vm11 = vmand %vm2820_vm14, %vm1966_vm15 }
  0xa6   : > { %vm1922_vm7 = vmxor %vm700_vm0, %vm2780_vm6  ;;  %vm2782_vm3 = vcmp.eq.s32.totalorder %v1884_v2, %v1880_v0  ;;  %v2822_v37 = vsel %vm2029_vm11, 4294967295, %v2821_v37  ;;  %vm2835_vm11 = vcmp.eq.s32.totalorder %v1884_v2, %v1880_v0 }
  0xa7   : > { %vm1950_vm13 = vmand %vm1905_vm2, %vm700_vm0 }
  0xa8   : > { %v1882_v1 = vpop.permute.xlu1 %681  ;;  %vm1989_vm0 = vmxor %vm2782_vm3, %vm2780_vm6 }
  0xa9   : > { %v1926_v11 = vpop.permute.xlu0 %678 }
  0xac   : > { %v688_v8 = vpop.permute.xlu1 %687 }
  0xad   : > { %vm2777_vm10 = vcmp.eq.s32.totalorder %v688_v8, %v1880_v0  ;;  %v685_v25 = vpop.permute.xlu0 %684  ;;  %vm2819_vm8 = vcmp.eq.s32.totalorder %v688_v8, %v1880_v0 }
  0xae   : > { %vm1981_vm4 = vmxor %vm2777_vm10, %vm2780_vm6  ;;  %vm2816_vm6 = vcmp.eq.s32.totalorder %v1878_v62, 1 }
  0xaf   : > { %v2810_v24 = vsel %vm1981_vm4, 4294967295, %v2809_v24  ;;  %vm2014_vm3 = vmand %vm2816_vm6, %vm1886_vm12 }
  0xb0   : > { %v1993_v29 = vpop.permute.xlu1 %693  ;;  %v2818_v33 = vsel %vm2014_vm3, 4294967295, %v2817_v33  ;;  %vm712_vm10 = vmand %vm1915_vm5, %vm2819_vm8  ;;  %vm2823_vm8 = vcmp.eq.s32.totalorder %v1866_v51, 1  ;;  %vm2826_vm3 = vcmp.eq.s32.totalorder %v1875_v57, 1 }
  0xb1   : > { %vm2045_vm14 = vmand %vm2823_vm8, %vm1966_vm15  ;;  %v691_v57 = vpop.permute.xlu0 %690 }
  0xb2   : > { %vm2053_vm6 = vmand %vm2826_vm3, %vm1966_vm15  ;;  %vm2832_vm3 = vcmp.eq.s32.totalorder %v1862_v49, 1  ;;  %vm2838_vm15 = vmmov 1  }
  0xb3   : > { %v2828_v43 = vsel %vm2053_vm6, 4294967295, %v2827_v43  ;;  %vm2074_vm8 = vmand %vm2832_vm3, %vm1886_vm12  ;;  %vm706_vm3 = vcmp.eq.s32.totalorder %v1993_v29, %v1880_v0 }
  0xb4   : > { %v2834_v47 = vsel %vm2074_vm8, 4294967295, %v2833_v47  ;;  %vm2842_vm12 = vmand %vm1905_vm2, %vm1922_vm7  ;;  %vm2846_vm7 = vnez %v2810_v24 }
 0x11c   : > { %v1550_v15 = vpop.f32.mrb[0].mxu0 }
 0x11d   : > { %v1556_v17 = vpop.f32.mrb[0].mxu1  ;;  %v544_v18 = vmul.f32 2.0, %v1550_v15  ;;  %v500_v20 = vpop.f32.mrb[1].mxu0 }
 0x11e   : > { %v548_v19 = vmul.f32 2.0, %v1556_v17  ;;  %v520_v21 = vpop.f32.mrb[1].mxu1  ;;  %v543_v26 = vmul.f32 2.0, %v500_v20 }
 0x11f   : > { %v547_v27 = vmul.f32 2.0, %v520_v21  ;;  %v1997_v30 = vsub.f32 %v1959_v16, %v544_v18 }
 0x120   : > { %v2000_v31 = vsub.f32 %v1959_v16, %v548_v19  ;;  %v1553_v35 = vpop.f32.mrb[2].mxu0  ;;  %v2038_v38 = vsub.f32 %v1959_v16, %v543_v26 }
 0x121   : > { %v2023_v34 = vsub.f32 %v1959_v16, %v547_v27  ;;  %v1559_v36 = vpop.f32.mrb[2].mxu1  ;;  %v510_v39 = vpop.f32.mrb[3].mxu0  ;;  %v746_v46 = vsel %vm1950_vm13, %v1997_v30, -3e+38  ;;  %vm2839_vm13 = vcmp.eq.s32.totalorder %v685_v25, %v1880_v0  ;;  %v778_v53 = vsel %vm2842_vm12, %v1997_v30, 3e+38 }
 0x122   : > { %v530_v40 = vpop.f32.mrb[3].mxu1  ;;  %v750_v41 = vsel %vm712_vm10, %v2000_v31, -3e+38  ;;  %vm2829_vm10 = vcmp.eq.s32.totalorder %v685_v25, %v1880_v0  ;;  %vm2090_vm6 = vmxor %vm2839_vm13, %vm2838_vm15  ;;  %v754_v52 = vmax.f32 %v746_v46, -3e+38  ;;  %vm2843_vm13 = vcmp.eq.s32.totalorder %v1882_v1, %v1880_v0 }
 0x123   : > { %vm2063_vm4 = vmand %vm1933_vm9, %vm2829_vm10  ;;  %v758_v45 = vmax.f32 %v750_v41, -3e+38  ;;  %v546_v58 = vmul.f32 2.0, %v1553_v35  ;;  %v549_v59 = vmul.f32 2.0, %v530_v40  ;;  %v550_v63 = vmul.f32 2.0, %v1559_v36 }
 0x124   : > { %vm2083_vm10 = vmand %vm1898_vm1, %vm2835_vm11  ;;  %v749_v54 = vsel %vm2063_vm4, %v2023_v34, -3e+38  ;;  %862 = vmax.xlane.f32.xlu1 %v754_v52  ;;  %v545_v2 = vmul.f32 2.0, %v510_v39  ;;  %v786_v3 = vmin.f32 %v778_v53, 3e+38 }
 0x125   : > { %vm723_vm11 = vmand %vm1898_vm1, %vm1989_vm0  ;;  %870 = vmax.xlane.f32.xlu0 %v758_v45  ;;  %v762_v4 = vsel %vm1905_vm2, %v1997_v30, -3e+38  ;;  %v757_v9 = vmax.f32 %v749_v54, -3e+38  ;;  %v766_v7 = vsel %vm1915_vm5, %v2000_v31, -3e+38  ;;  %v2164_v14 = vsub.f32 %v1959_v16, %v546_v58 }
 0x126   : > { %vm2113_vm8 = vmxor %vm2843_vm13, %vm2838_vm15  ;;  %v777_v61 = vsel %vm723_vm11, %v2038_v38, 3e+38  ;;  %vm2788_vm11 = vcmp.eq.s32.totalorder %v1926_v11, %v1880_v0  ;;  %v761_v1 = vsel %vm1898_vm1, %v2038_v38, -3e+38  ;;  %v2167_v15 = vsub.f32 %v1959_v16, %v549_v59 }
 0x127   : > { %vm2847_vm0 = vmand %vm1915_vm5, %vm2846_vm7  ;;  %vm2855_vm5 = vnez %v2815_v32  ;;  %v765_v17 = vsel %vm1933_vm9, %v2023_v34, -3e+38  ;;  %v2184_v19 = vsub.f32 %v1959_v16, %v550_v63  ;;  %v2198_v24 = vsub.f32 %v1959_v16, %v545_v2 }
 0x128   : > { %v782_v60 = vsel %vm2847_vm0, %v2000_v31, 3e+38  ;;  %vm727_vm4 = vmand %vm1933_vm9, %vm2090_vm6  ;;  %vm705_vm6 = vcmp.eq.s32.totalorder %v691_v57, %v1880_v0  ;;  %vm2852_vm0 = vnez %v2808_v23  ;;  %868 = vmax.xlane.f32.xlu1 %v757_v9  ;;  %v794_v6 = vsel %vm2855_vm5, %v1997_v30, 3e+38 }
 0x129   : > { %vm2848_vm12 = vmmov %vm2843_vm13  ;;  %vm2849_vm13 = vnez %v2802_v13  ;;  %v781_v10 = vsel %vm727_vm4, %v2023_v34, 3e+38  ;;  %966 = vmin.xlane.f32.xlu0 %v786_v3  ;;  %v790_v20 = vmin.f32 %v782_v60, 3e+38  ;;  %vm2859_vm9 = vnez %v2818_v33 }
 0x12a   : > { %vm2136_vm7 = vmand %vm2849_vm13, %vm2848_vm12  ;;  %vm2858_vm12 = vnez %v2822_v37  ;;  %v785_v25 = vmin.f32 %v777_v61, 3e+38  ;;  %v793_v26 = vsel %vm2045_vm14, %v2038_v38, 3e+38  ;;  %v745_v16 = vsel %vm2083_vm10, %v2038_v38, -3e+38 }
 0x12b   : > { %vm726_vm2 = vmand %vm2849_vm13, %vm2113_vm8  ;;  %v798_v21 = vsel %vm2858_vm12, %v2000_v31, 3e+38  ;;  %v748_v32 = vsel %vm2136_vm7, %v2164_v14, -3e+38  ;;  %vm2867_vm10 = vnez %v2834_v47  ;;  %v789_v35 = vmin.f32 %v781_v10, 3e+38 }
 0x12c   : > { %vm2159_vm4 = vmand %vm2852_vm0, %vm706_vm3  ;;  %964 = vmin.xlane.f32.xlu1 %v785_v25  ;;  %v780_v37 = vsel %vm726_vm2, %v2164_v14, 3e+38  ;;  %v763_v40 = vsel %vm2867_vm10, %v2198_v24, -3e+38  ;;  %vm2868_vm7 = vnez %v2806_v22  ;;  %vm2869_vm8 = vcmp.eq.s32.totalorder %v1862_v49, 1 }
 0x12d   : > { %vm2179_vm1 = vmxor %vm2788_vm11, %vm2838_vm15  ;;  %vm2862_vm11 = vnez %v2828_v43  ;;  %974 = vmin.xlane.f32.xlu0 %v790_v20  ;;  %v752_v29 = vsel %vm2159_vm4, %v2184_v19, -3e+38  ;;  %v774_v42 = vmax.f32 %v766_v7, -3e+38  ;;  %v764_v43 = vsel %vm2849_vm13, %v2164_v14, -3e+38 }
 0x12e   : > { %vm2193_vm5 = vmand %vm2859_vm9, %vm705_vm6  ;;  %v797_v27 = vsel %vm2862_vm11, %v2023_v34, 3e+38  ;;  %v770_v34 = vmax.f32 %v762_v4, -3e+38  ;;  %v769_v45 = vmax.f32 %v761_v1, -3e+38 }
 0x12f   : > { %vm2209_vm12 = vmxor %vm705_vm6, %vm2838_vm15  ;;  %v751_v31 = vsel %vm2193_vm5, %v2167_v15, -3e+38  ;;  %vm2872_vm6 = vcmp.eq.s32.totalorder %v1864_v50, 1  ;;  %v767_v49 = vsel %vm2859_vm9, %v2167_v15, -3e+38  ;;  %vm2875_vm13 = vcmp.eq.s32.totalorder %v1878_v62, 1 }
 0x130   : > { %vm2220_vm14 = vmxor %vm706_vm3, %vm2838_vm15  ;;  %972 = vmin.xlane.f32.xlu1 %v789_v35  ;;  %v768_v46 = vsel %vm2852_vm0, %v2184_v19, -3e+38  ;;  %v773_v48 = vmax.f32 %v765_v17, -3e+38  ;;  %v806_v52 = vmin.f32 %v798_v21, 3e+38 }
 0x131   : > { %vm725_vm11 = vmand %vm2867_vm10, %vm2179_vm1  ;;  %1070 = vmax.xlane.f32.xlu0 %v770_v34  ;;  %v801_v22 = vmin.f32 %v793_v26, 3e+38  ;;  %v805_v53 = vmin.f32 %v797_v27, 3e+38  ;;  %v756_v54 = vmax.f32 %v748_v32, -3e+38 }
 0x132   : > { %vm729_vm15 = vmand %vm2859_vm9, %vm2209_vm12  ;;  %v779_v36 = vsel %vm725_vm11, %v2198_v24, 3e+38  ;;  %vm2878_vm9 = vcmp.eq.s32.totalorder %v1926_v11, %v1880_v0  ;;  %v802_v11 = vmin.f32 %v794_v6, 3e+38  ;;  %v759_v56 = vmax.f32 %v751_v31, -3e+38 }
 0x133   : > { %vm730_vm3 = vmand %vm2852_vm0, %vm2220_vm14  ;;  %v783_v38 = vsel %vm729_vm15, %v2167_v15, 3e+38  ;;  %vm2881_vm0 = vcmp.eq.s32.totalorder %v1870_v55, 1  ;;  %v753_v55 = vmax.f32 %v745_v16, -3e+38  ;;  %v2334_v20 = vld [vmem:[%s2326_s12 + $0x20] sm:$0xff] }
 0x134   : > { %v784_v39 = vsel %vm730_vm3, %v2184_v19, 3e+38  ;;  %vm2261_vm2 = vmand %vm2869_vm8, %vm2868_vm7  ;;  %1068 = vmax.xlane.f32.xlu1 %v769_v45  ;;  %v760_v57 = vmax.f32 %v752_v29, -3e+38  ;;  %v787_v58 = vmin.f32 %v779_v36, 3e+38 }
 0x135   : > { %vm2272_vm4 = vmand %vm2872_vm6, %vm2868_vm7  ;;  %1078 = vmax.xlane.f32.xlu0 %v774_v42  ;;  %v795_v50 = vsel %vm2261_vm2, %v2198_v24, 3e+38  ;;  %v788_v59 = vmin.f32 %v780_v37, 3e+38  ;;  %v791_v60 = vmin.f32 %v783_v38, 3e+38 }
 0x136   : > { %vm2286_vm1 = vmand %vm2875_vm13, %vm2868_vm7  ;;  %v796_v62 = vsel %vm2272_vm4, %v2164_v14, 3e+38  ;;  %v792_v61 = vmin.f32 %v784_v39, 3e+38  ;;  %v771_v63 = vmax.f32 %v763_v40, -3e+38 }
 0x137   : > { %vm2298_vm5 = vmand %vm2867_vm10, %vm2878_vm9  ;;  %v799_v33 = vsel %vm2286_vm1, %v2167_v15, 3e+38  ;;  %v772_v2 = vmax.f32 %v764_v43, -3e+38  ;;  %v775_v3 = vmax.f32 %v767_v49, -3e+38 }
 0x138   : > { %vm2312_vm12 = vmand %vm2881_vm0, %vm2868_vm7  ;;  %v747_v47 = vsel %vm2298_vm5, %v2198_v24, -3e+38  ;;  %1076 = vmax.xlane.f32.xlu1 %v773_v48  ;;  %v776_v4 = vmax.f32 %v768_v46, -3e+38  ;;  %v803_v8 = vmin.f32 %v795_v50, 3e+38 }
 0x139   : > { %v800_v51 = vsel %vm2312_vm12, %v2184_v19, 3e+38  ;;  %1174 = vmin.xlane.f32.xlu0 %v802_v11  ;;  %v804_v9 = vmin.f32 %v796_v62, 3e+38  ;;  %v807_v10 = vmin.f32 %v799_v33, 3e+38 }
 0x13a   : > { %v755_v7 = vmax.f32 %v747_v47, -3e+38  ;;  %v808_v1 = vmin.f32 %v800_v51, 3e+38  ;;  %v845_v14 = vld [vmem:[%s2326_s12 + $0x8] sm:$0xff]  ;;  %v2342_v16 = vld [vmem:[%s2326_s12] sm:$0xff] }
 0x13b   : > { %vm1292_vm3 = vcmask 7168  }
 0x13c   : > { %1172 = vmin.xlane.f32.xlu1 %v801_v22 }
 0x13d   : > { %1182 = vmin.xlane.f32.xlu0 %v806_v52 }
 0x140   : > { %1180 = vmin.xlane.f32.xlu1 %v805_v53 }
 0x141   : > { %860 = vmax.xlane.f32.xlu0 %v753_v55 }
 0x144   : > { %872 = vmax.xlane.f32.xlu1 %v759_v56 }
 0x145   : > { %866 = vmax.xlane.f32.xlu0 %v756_v54 }
 0x148   : > { %968 = vmin.xlane.f32.xlu1 %v787_v58 }
 0x149   : > { %874 = vmax.xlane.f32.xlu0 %v760_v57 }
 0x14c   : > { %976 = vmin.xlane.f32.xlu1 %v791_v60 }
 0x14d   : > { %970 = vmin.xlane.f32.xlu0 %v788_v59 }
 0x150   : > { %1072 = vmax.xlane.f32.xlu1 %v771_v63 }
 0x151   : > { %978 = vmin.xlane.f32.xlu0 %v792_v61 }
 0x154   : > { %1080 = vmax.xlane.f32.xlu1 %v775_v3 }
 0x155   : > { %1074 = vmax.xlane.f32.xlu0 %v772_v2 }
 0x158   : > { %1176 = vmin.xlane.f32.xlu1 %v803_v8 }
 0x159   : > { %1082 = vmax.xlane.f32.xlu0 %v776_v4 }
 0x15c   : > { %1184 = vmin.xlane.f32.xlu1 %v807_v10 }
 0x15d   : > { %1178 = vmin.xlane.f32.xlu0 %v804_v9 }
 0x161   : > { %864 = vmax.xlane.f32.xlu0 %v755_v7 }
 0x165   : > { %1186 = vmin.xlane.f32.xlu0 %v808_v1 }
 0x1b1   : > { %v863_v17 = vpop.xlane.xlu1 %862 }
 0x1b2   : > { %v871_v15 = vpop.xlane.xlu0 %870  ;;  %v877_v18 = vadd.f32 %v863_v17, %v845_v14 }
 0x1b3   : > { %v881_v6 = vadd.f32 %v871_v15, %v2329_v5 }
 0x1b4   : > { %v885_v21 = vmax.f32 %v877_v18, 1e-12 }
 0x1b5   : > { %v889_v19 = vmax.f32 %v881_v6, 1e-12  ;;  %v869_v26 = vpop.xlane.xlu1 %868 }
 0x1b6   : > { %v967_v12 = vpop.xlane.xlu0 %966  ;;  %v2338_v27 = vmin.f32 %v885_v21, 3e+38  ;;  %v880_v28 = vadd.f32 %v869_v26, %v2334_v20 }
 0x1b7   : > { %v2336_v24 = vmin.f32 %v889_v19, 3e+38  ;;  %v981_v25 = vadd.f32 %v967_v12, %v845_v14 }
 0x1b8   : > { %1636 = vrsqrt.f32 %v2338_v27  ;;  %v888_v29 = vmax.f32 %v880_v28, 1e-12  ;;  %vm909_vm11 = vcmp.eq.f32.partialorder %v2338_v27, inf  ;;  %vm911_vm15 = vcmp.eq.f32.partialorder %v2338_v27, 0.0 }
 0x1b9   : > { %1638 = vrsqrt.f32 %v2336_v24  ;;  %v989_v31 = vmax.f32 %v981_v25, 1e-12  ;;  %v965_v34 = vpop.xlane.xlu1 %964  ;;  %vm937_vm14 = vcmp.eq.f32.partialorder %v2336_v24, inf  ;;  %vm939_vm10 = vcmp.eq.f32.partialorder %v2336_v24, 0.0 }
 0x1ba   : > { %v975_v30 = vpop.xlane.xlu0 %974  ;;  %v980_v35 = vadd.f32 %v965_v34, %v2342_v16  ;;  %v2348_v40 = vmin.f32 %v888_v29, 3e+38  ;;  %v940_v48 = vand.u32 2147483648, %v2336_v24  ;;  %v912_v57 = vand.u32 2147483648, %v2338_v27 }
 0x1bb   : > { %v985_v32 = vadd.f32 %v975_v30, %v2329_v5  ;;  %v997_v36 = vmin.f32 %v989_v31, 3e+38 }
 0x1bc   : > { %v988_v41 = vmax.f32 %v980_v35, 1e-12  ;;  %vm930_vm2 = vcmp.eq.f32.partialorder %v2348_v40, inf  ;;  %vm932_vm6 = vcmp.eq.f32.partialorder %v2348_v40, 0.0  ;;  %v933_v12 = vand.u32 2147483648, %v2348_v40 }
 0x1bd   : > { %v993_v37 = vmax.f32 %v985_v32, 1e-12  ;;  %1640 = vrsqrt.f32 %v997_v36  ;;  %v973_v39 = vpop.xlane.xlu1 %972  ;;  %vm1013_vm7 = vcmp.eq.f32.partialorder %v997_v36, inf  ;;  %v1016_v63 = vand.u32 2147483648, %v997_v36 }
 0x1be   : > { %v1071_v38 = vpop.xlane.xlu0 %1070  ;;  %v984_v44 = vadd.f32 %v973_v39, %v2334_v20  ;;  %v2355_v13 = vmin.f32 %v988_v41, 3e+38  ;;  %vm1015_vm8 = vcmp.eq.f32.partialorder %v997_v36, 0.0 }
 0x1bf   : > { %v2350_v42 = vmin.f32 %v993_v37, 3e+38  ;;  %v1085_v43 = vadd.f32 %v1071_v38, %v845_v14 }
 0x1c0   : > { %v992_v62 = vmax.f32 %v984_v44, 1e-12  ;;  %vm1006_vm1 = vcmp.eq.f32.partialorder %v2355_v13, inf }
 0x1c1   : > { %1642 = vrsqrt.f32 %v2350_v42  ;;  %v1069_v49 = vpop.xlane.xlu1 %1068  ;;  %v1093_v23 = vmax.f32 %v1085_v43, 1e-12  ;;  %vm1041_vm4 = vcmp.eq.f32.partialorder %v2350_v42, inf  ;;  %v1044_v25 = vand.u32 2147483648, %v2350_v42 }
 0x1c2   : > { %v1079_v45 = vpop.xlane.xlu0 %1078  ;;  %v1637_v46 = vpop.eup %1636  ;;  %1644 = vrsqrt.f32 %v2348_v40  ;;  %v1084_v11 = vadd.f32 %v1069_v49, %v2342_v16  ;;  %v2365_v52 = vmin.f32 %v992_v62, 3e+38  ;;  %vm1043_vm13 = vcmp.eq.f32.partialorder %v2350_v42, 0.0 }
 0x1c3   : > { %v1639_v50 = vpop.eup %1638  ;;  %v908_v33 = vmul.f32 %v1637_v46, %v2338_v27  ;;  %v1089_v0 = vadd.f32 %v1079_v45, %v2329_v5  ;;  %v2363_v51 = vmin.f32 %v1093_v23, 3e+38  ;;  %1646 = vrsqrt.f32 %v2355_v13 }
 0x1c4   : > { %v936_v55 = vmul.f32 %v1639_v50, %v2336_v24  ;;  %v1092_v54 = vmax.f32 %v1084_v11, 1e-12  ;;  %1648 = vrsqrt.f32 %v2365_v52  ;;  %vm1034_vm5 = vcmp.eq.f32.partialorder %v2365_v52, inf }
 0x1c5   : > { %v1077_v22 = vpop.xlane.xlu1 %1076  ;;  %v1097_v53 = vmax.f32 %v1089_v0, 1e-12  ;;  %v910_v59 = vsel %vm909_vm11, %v2338_v27, %v908_v33  ;;  %1650 = vrsqrt.f32 %v2363_v51  ;;  %vm1117_vm9 = vcmp.eq.f32.partialorder %v2363_v51, inf }
 0x1c6   : > { %v1175_v47 = vpop.xlane.xlu0 %1174  ;;  %v2377_v3 = vmin.f32 %v1092_v54, 3e+38  ;;  %v938_v8 = vsel %vm937_vm14, %v2336_v24, %v936_v55  ;;  %v913_v7 = vsel %vm911_vm15, %v912_v57, %v910_v59  ;;  %v1088_v15 = vadd.f32 %v1077_v22, %v2334_v20  ;;  %v2445_v57 = vld [vmem:[%s2326_s12 + $0x30] sm:$0xff] }
 0x1c7   : > { %v1641_v56 = vpop.eup %1640  ;;  %v1189_v58 = vadd.f32 %v1175_v47, %v845_v14  ;;  %v2375_v2 = vmin.f32 %v1097_v53, 3e+38  ;;  %v941_v27 = vsel %vm939_vm10, %v940_v48, %v938_v8  ;;  %v1037_v38 = vand.u32 2147483648, %v2365_v52 }
 0x1c8   : > { %v1012_v60 = vmul.f32 %v1641_v56, %v997_v36  ;;  %v1096_v24 = vmax.f32 %v1088_v15, 1e-12  ;;  %vm1119_vm0 = vcmp.eq.f32.partialorder %v2363_v51, 0.0  ;;  %v1120_v47 = vand.u32 2147483648, %v2363_v51 }
 0x1c9   : > { %v1173_v4 = vpop.xlane.xlu1 %1172  ;;  %v1197_v14 = vmax.f32 %v1189_v58, 1e-12  ;;  %1652 = vrsqrt.f32 %v2375_v2  ;;  %vm1036_vm12 = vcmp.eq.f32.partialorder %v2365_v52, 0.0  ;;  %vm1145_vm14 = vcmp.eq.f32.partialorder %v2375_v2, inf }
 0x1ca   : > { %v1183_v61 = vpop.xlane.xlu0 %1182  ;;  %v1014_v9 = vsel %vm1013_vm7, %v997_v36, %v1012_v60  ;;  %1654 = vrsqrt.f32 %v2377_v3  ;;  %v1009_v36 = vand.u32 2147483648, %v2355_v13  ;;  %v1188_v23 = vadd.f32 %v1173_v4, %v2342_v16 }
 0x1cb   : > { %v1643_v10 = vpop.eup %1642  ;;  %v1017_v1 = vsel %vm1015_vm8, %v1016_v63, %v1014_v9  ;;  %v1193_v19 = vadd.f32 %v1183_v61, %v2329_v5  ;;  %v2406_v32 = vmin.f32 %v1197_v14, 3e+38  ;;  %vm1147_vm10 = vcmp.eq.f32.partialorder %v2375_v2, 0.0  ;;  %v2455_v61 = vld [vmem:[%s2326_s12 + $0x18] sm:$0xff] }
 0x1cc   : > { %v1645_v6 = vpop.eup %1644  ;;  %v1269_v17 = vsub.f32 %v913_v7, %v1017_v1  ;;  %v1040_v18 = vmul.f32 %v1643_v10, %v2350_v42  ;;  %vm1110_vm11 = vcmp.eq.f32.partialorder %v2377_v3, inf  ;;  %v1196_v56 = vmax.f32 %v1188_v23, 1e-12 }
 0x1cd   : > { %v1181_v26 = vpop.xlane.xlu1 %1180  ;;  %v929_v5 = vmul.f32 %v1645_v6, %v2348_v40  ;;  %v1647_v34 = vpop.eup %1646  ;;  %v1201_v37 = vmax.f32 %v1193_v19, 1e-12  ;;  %1656 = vrsqrt.f32 %v2406_v32  ;;  %vm1112_vm15 = vcmp.eq.f32.partialorder %v2377_v3, 0.0 }
 0x1ce   : > { %v861_v21 = vpop.xlane.xlu0 %860  ;;  %v1277_v28 = vadd.f32 0.3, %v1269_v17  ;;  %v1042_v30 = vsel %vm1041_vm4, %v2350_v42, %v1040_v18  ;;  %v1649_v39 = vpop.eup %1648  ;;  %v2415_v42 = vmin.f32 %v1096_v24, 3e+38  ;;  %v1005_v46 = vmul.f32 %v1647_v34, %v2355_v13 }
 0x1cf   : > { %v1045_v31 = vsel %vm1043_vm13, %v1044_v25, %v1042_v30  ;;  %v2417_v43 = vmin.f32 %v1201_v37, 3e+38  ;;  %v1651_v45 = vpop.eup %1650  ;;  %v931_v49 = vsel %vm930_vm2, %v2348_v40, %v929_v5  ;;  %v1033_v50 = vmul.f32 %v1649_v39, %v2365_v52 }
 0x1d0   : > { %v1285_v29 = vmax.f32 %v1277_v28, 0.0  ;;  %v1273_v35 = vsub.f32 %v941_v27, %v1045_v31  ;;  %1658 = vrsqrt.f32 %v2415_v42  ;;  %v1192_v0 = vadd.f32 %v1181_v26, %v2334_v20  ;;  %v2488_v27 = vld [vmem:[%s2326_s12 + $0x38] sm:$0xff] }
 0x1d1   : > { %v873_v62 = vpop.xlane.xlu1 %872  ;;  %v876_v11 = vadd.f32 %v861_v21, %v2342_v16  ;;  %v1035_v48 = vsel %vm1034_vm5, %v2365_v52, %v1033_v50  ;;  %v934_v55 = vsel %vm932_vm6, %v933_v12, %v931_v49  ;;  %v1116_v20 = vmul.f32 %v1651_v45, %v2363_v51 }
 0x1d2   : > { %1294 = vst.msk [vmem:[%s2402_s16 + $0x8] sm:$0xff] %vm1292_vm3, %v1285_v29  ;;  %v1281_v41 = vadd.f32 0.3, %v1273_v35  ;;  %v867_v44 = vpop.xlane.xlu0 %866  ;;  %v1038_v16 = vsel %vm1036_vm12, %v1037_v38, %v1035_v48  ;;  %1660 = vrsqrt.f32 %v2417_v43  ;;  %v1148_v52 = vand.u32 2147483648, %v2375_v2 }
 0x1d3   : > { %v1653_v22 = vpop.eup %1652  ;;  %v1272_v54 = vsub.f32 %v934_v55, %v1038_v16  ;;  %v2450_v40 = vsel %vm1006_vm1, %v2355_v13, %v1005_v46  ;;  %v1113_v58 = vand.u32 2147483648, %v2377_v3  ;;  %v1200_v59 = vmax.f32 %v1192_v0, 1e-12 }
 0x1d4   : > { %v1289_v33 = vmax.f32 %v1281_v41, 0.0  ;;  %v1655_v53 = vpop.eup %1654  ;;  %v884_v60 = vmax.f32 %v876_v11, 1e-12  ;;  %v1144_v8 = vmul.f32 %v1653_v22, %v2375_v2  ;;  %vm1221_vm7 = vcmp.eq.f32.partialorder %v2406_v32, inf }
 0x1d5   : > { %v1280_v4 = vadd.f32 0.3, %v1272_v54  ;;  %v2459_v9 = vmin.f32 %v1196_v56, 3e+38  ;;  %v2461_v10 = vpop.xlane.xlu1 %968  ;;  %v1118_v7 = vsel %vm1117_vm9, %v2363_v51, %v1116_v20  ;;  %v1109_v1 = vmul.f32 %v1655_v53, %v2377_v3 }
 0x1d6   : > { %1298 = vst.msk [vmem:[%s2402_s16 + $0x28] sm:$0xff] %vm1292_vm3, %v1289_v33  ;;  %v875_v63 = vpop.xlane.xlu0 %874  ;;  %v2467_v14 = vmin.f32 %v1200_v59, 3e+38  ;;  %v2469_v15 = vmin.f32 %v884_v60, 3e+38  ;;  %v882_v18 = vadd.f32 %v873_v62, %v2445_v57  ;;  %v879_v19 = vadd.f32 %v867_v44, %v2455_v61 }
 0x1d7   : > { %v1657_v6 = vpop.eup %1656  ;;  %v1288_v17 = vmax.f32 %v1280_v4, 0.0  ;;  %1662 = vrsqrt.f32 %v2459_v9  ;;  %vm1223_vm8 = vcmp.eq.f32.partialorder %v2406_v32, 0.0  ;;  %v1224_v12 = vand.u32 2147483648, %v2406_v32 }
 0x1d8   : > { %v1220_v21 = vmul.f32 %v1657_v6, %v2406_v32  ;;  %1664 = vrsqrt.f32 %v2467_v14  ;;  %v1121_v25 = vsel %vm1119_vm0, %v1120_v47, %v1118_v7  ;;  %v1146_v26 = vsel %vm1145_vm14, %v2375_v2, %v1144_v8 }
 0x1d9   : > { %1297 = vst.msk [vmem:[%s2402_s16 + $0x20] sm:$0xff] %vm1292_vm3, %v1288_v17  ;;  %vm1138_vm2 = vcmp.eq.f32.partialorder %v2415_v42, inf  ;;  %1666 = vrsqrt.f32 %v2469_v15  ;;  %v1111_v30 = vsel %vm1110_vm11, %v2377_v3, %v1109_v1  ;;  %v1141_v5 = vand.u32 2147483648, %v2415_v42  ;;  %v977_v35 = vpop.xlane.xlu1 %976 }
 0x1da   : > { %v1659_v28 = vpop.eup %1658  ;;  %v1222_v51 = vsel %vm1221_vm7, %v2406_v32, %v1220_v21  ;;  %vm1249_vm6 = vcmp.eq.f32.partialorder %v2417_v43, inf  ;;  %v971_v31 = vpop.xlane.xlu0 %970  ;;  %vm1140_vm4 = vcmp.eq.f32.partialorder %v2415_v42, 0.0  ;;  %vm1251_vm13 = vcmp.eq.f32.partialorder %v2417_v43, 0.0 }
 0x1db   : > { %v1225_v24 = vsel %vm1223_vm8, %v1224_v12, %v1222_v51  ;;  %v890_v34 = vmax.f32 %v882_v18, 1e-12  ;;  %v887_v29 = vmax.f32 %v879_v19, 1e-12  ;;  %v1149_v38 = vsel %vm1147_vm10, %v1148_v52, %v1146_v26  ;;  %v2574_v26 = vld [vmem:[%s2326_s12 + $0x10] sm:$0xff] }
 0x1dc   : > { %v1661_v37 = vpop.eup %1660  ;;  %v1302_v39 = vsub.f32 %v1121_v25, %v1225_v24  ;;  %v1252_v32 = vand.u32 2147483648, %v2417_v43  ;;  %v883_v41 = vadd.f32 %v875_v63, %v2488_v27  ;;  %v1114_v44 = vsel %vm1112_vm15, %v1113_v58, %v1111_v30 }
 0x1dd   : > { %v1137_v45 = vmul.f32 %v1659_v28, %v2415_v42  ;;  %v1248_v49 = vmul.f32 %v1661_v37, %v2417_v43  ;;  %v2508_v46 = vmin.f32 %v890_v34, 3e+38  ;;  %vm1008_vm1 = vcmp.eq.f32.partialorder %v2355_v13, 0.0  ;;  %v1073_v16 = vpop.xlane.xlu1 %1072 }
 0x1de   : > { %v1310_v50 = vadd.f32 0.3, %v1302_v39  ;;  %vm1214_vm9 = vcmp.eq.f32.partialorder %v2459_v9, inf  ;;  %vm1216_vm5 = vcmp.eq.f32.partialorder %v2459_v9, 0.0  ;;  %v2513_v2 = vmin.f32 %v887_v29, 3e+38  ;;  %v979_v47 = vpop.xlane.xlu0 %978 }
 0x1df   : > { %v1250_v3 = vsel %vm1249_vm6, %v2417_v43, %v1248_v49  ;;  %v1217_v23 = vand.u32 2147483648, %v2459_v9  ;;  %vm1242_vm0 = vcmp.eq.f32.partialorder %v2467_v14, inf  ;;  %v891_v62 = vmax.f32 %v883_v41, 1e-12 }
 0x1e0   : > { %v1318_v33 = vmax.f32 %v1310_v50, 0.0  ;;  %v1253_v0 = vsel %vm1251_vm13, %v1252_v32, %v1250_v3  ;;  %vm1244_vm12 = vcmp.eq.f32.partialorder %v2467_v14, 0.0  ;;  %v983_v11 = vadd.f32 %v971_v31, %v2455_v61 }
 0x1e1   : > { %v1663_v48 = vpop.eup %1662  ;;  %v1139_v22 = vsel %vm1138_vm2, %v2415_v42, %v1137_v45  ;;  %v1306_v55 = vsub.f32 %v1149_v38, %v1253_v0  ;;  %v1245_v20 = vand.u32 2147483648, %v2467_v14  ;;  %1668 = vrsqrt.f32 %v2508_v46  ;;  %v1081_v28 = vpop.xlane.xlu1 %1080 }
 0x1e2   : > { %v1665_v53 = vpop.eup %1664  ;;  %1326 = vst.msk [vmem:[%s2519_s19 + $0x8] sm:$0xff] %vm1292_vm3, %v1318_v33  ;;  %v1213_v43 = vmul.f32 %v1663_v48, %v2459_v9  ;;  %vm902_vm14 = vcmp.eq.f32.partialorder %v2469_v15, inf  ;;  %vm904_vm10 = vcmp.eq.f32.partialorder %v2469_v15, 0.0  ;;  %1670 = vrsqrt.f32 %v2513_v2  ;;  %v1075_v12 = vpop.xlane.xlu0 %1074 }
 0x1e3   : > { %v1667_v54 = vpop.eup %1666  ;;  %v1314_v52 = vadd.f32 0.3, %v1306_v55  ;;  %v1241_v56 = vmul.f32 %v1665_v53, %v2467_v14  ;;  %v905_v58 = vand.u32 2147483648, %v2469_v15  ;;  %v2543_v59 = vmin.f32 %v891_v62, 3e+38 }
 0x1e4   : > { %v1142_v60 = vsel %vm1140_vm4, %v1141_v5, %v1139_v22  ;;  %v1215_v63 = vsel %vm1214_vm9, %v2459_v9, %v1213_v43  ;;  %v901_v4 = vmul.f32 %v1667_v54, %v2469_v15  ;;  %v991_v8 = vmax.f32 %v983_v11, 1e-12 }
 0x1e5   : > { %v1322_v7 = vmax.f32 %v1314_v52, 0.0  ;;  %v1218_v1 = vsel %vm1216_vm5, %v1217_v23, %v1215_v63  ;;  %v1243_v6 = vsel %vm1242_vm0, %v2467_v14, %v1241_v56  ;;  %v986_v17 = vadd.f32 %v977_v35, %v2445_v57 }
 0x1e6   : > { %v1301_v42 = vsub.f32 %v1114_v44, %v1218_v1  ;;  %v1246_v18 = vsel %vm1244_vm12, %v1245_v20, %v1243_v6  ;;  %v903_v19 = vsel %vm902_vm14, %v2469_v15, %v901_v4  ;;  %v987_v21 = vadd.f32 %v979_v47, %v2488_v27  ;;  %v1083_v39 = vpop.xlane.xlu0 %1082  ;;  %v1177_v44 = vpop.xlane.xlu1 %1176 }
 0x1e7   : > { %v1010_v9 = vsel %vm1008_vm1, %v1009_v36, %v2450_v40  ;;  %1330 = vst.msk [vmem:[%s2519_s19 + $0x28] sm:$0xff] %vm1292_vm3, %v1322_v7  ;;  %v1305_v25 = vsub.f32 %v1142_v60, %v1246_v18  ;;  %v906_v14 = vsel %vm904_vm10, %v905_v58, %v903_v19  ;;  %1672 = vrsqrt.f32 %v2543_v59 }
 0x1e8   : > { %v1309_v30 = vadd.f32 0.3, %v1301_v42  ;;  %v1268_v51 = vsub.f32 %v906_v14, %v1010_v9  ;;  %v2576_v31 = vmin.f32 %v991_v8, 3e+38  ;;  %v994_v13 = vmax.f32 %v986_v17, 1e-12 }
 0x1e9   : > { %v1313_v5 = vadd.f32 0.3, %v1305_v25  ;;  %v982_v15 = vadd.f32 %v2461_v10, %v2574_v26  ;;  %v995_v24 = vmax.f32 %v987_v21, 1e-12  ;;  %v1086_v35 = vadd.f32 %v1073_v16, %v2574_v26 }
 0x1ea   : > { %v1317_v36 = vmax.f32 %v1309_v30, 0.0  ;;  %v1276_v40 = vadd.f32 0.3, %v1268_v51  ;;  %1674 = vrsqrt.f32 %v2576_v31  ;;  %v2586_v32 = vmin.f32 %v994_v13, 3e+38  ;;  %v1179_v22 = vpop.xlane.xlu0 %1178  ;;  %v1185_v53 = vpop.xlane.xlu1 %1184 }
 0x1eb   : > { %v1669_v34 = vpop.eup %1668  ;;  %v1321_v29 = vmax.f32 %v1313_v5, 0.0  ;;  %v2588_v41 = vmin.f32 %v995_v24, 3e+38  ;;  %v990_v45 = vmax.f32 %v982_v15, 1e-12  ;;  %v1087_v49 = vadd.f32 %v1075_v12, %v2455_v61 }
 0x1ec   : > { %v1671_v37 = vpop.eup %1670  ;;  %1325 = vst.msk [vmem:[%s2519_s19] sm:$0xff] %vm1292_vm3, %v1317_v36  ;;  %v1284_v38 = vmax.f32 %v1276_v40, 0.0  ;;  %v943_v10 = vmul.f32 %v1669_v34, %v2508_v46  ;;  %vm944_vm11 = vcmp.eq.f32.partialorder %v2508_v46, inf  ;;  %1676 = vrsqrt.f32 %v2586_v32 }
 0x1ed   : > { %1329 = vst.msk [vmem:[%s2519_s19 + $0x20] sm:$0xff] %vm1292_vm3, %v1321_v29  ;;  %v922_v50 = vmul.f32 %v1671_v37, %v2513_v2  ;;  %v1094_v3 = vmax.f32 %v1086_v35, 1e-12  ;;  %vm946_vm15 = vcmp.eq.f32.partialorder %v2508_v46, 0.0  ;;  %v947_v23 = vand.u32 2147483648, %v2508_v46 }
 0x1ee   : > { %1293 = vst.msk [vmem:[%s2402_s16] sm:$0xff] %vm1292_vm3, %v1284_v38  ;;  %1678 = vrsqrt.f32 %v2588_v41  ;;  %v1090_v62 = vadd.f32 %v1081_v28, %v2445_v57  ;;  %vm923_vm7 = vcmp.eq.f32.partialorder %v2513_v2, inf  ;;  %vm925_vm8 = vcmp.eq.f32.partialorder %v2513_v2, 0.0  ;;  %v865_v5 = vpop.xlane.xlu0 %864 }
 0x1ef   : > { %v926_v0 = vand.u32 2147483648, %v2513_v2  ;;  %v1095_v11 = vmax.f32 %v1087_v49, 1e-12  ;;  %v945_v47 = vsel %vm944_vm11, %v2508_v46, %v943_v10  ;;  %vm951_vm2 = vcmp.eq.f32.partialorder %v2543_v59, inf }
 0x1f0   : > { %vm953_vm6 = vcmp.eq.f32.partialorder %v2543_v59, 0.0  ;;  %v2607_v48 = vmin.f32 %v990_v45, 3e+38  ;;  %v924_v55 = vsel %vm923_vm7, %v2513_v2, %v922_v50  ;;  %v954_v20 = vand.u32 2147483648, %v2543_v59 }
 0x1f1   : > { %v1673_v33 = vpop.eup %1672  ;;  %vm1027_vm4 = vcmp.eq.f32.partialorder %v2576_v31, inf  ;;  %v2612_v16 = vmin.f32 %v1094_v3, 3e+38  ;;  %vm1029_vm13 = vcmp.eq.f32.partialorder %v2576_v31, 0.0  ;;  %v1030_v54 = vand.u32 2147483648, %v2576_v31 }
 0x1f2   : > { %v950_v43 = vmul.f32 %v1673_v33, %v2543_v59  ;;  %v1098_v52 = vmax.f32 %v1090_v62, 1e-12  ;;  %v948_v58 = vsel %vm946_vm15, %v947_v23, %v945_v47  ;;  %v2619_v60 = vmin.f32 %v1095_v11, 3e+38 }
 0x1f3   : > { %v1190_v63 = vadd.f32 %v1177_v44, %v2574_v26  ;;  %v1191_v4 = vadd.f32 %v1179_v22, %v2455_v61  ;;  %v927_v8 = vsel %vm925_vm8, %v926_v0, %v924_v55  ;;  %vm1048_vm1 = vcmp.eq.f32.partialorder %v2586_v32, inf }
 0x1f4   : > { %v1675_v56 = vpop.eup %1674  ;;  %v1194_v1 = vadd.f32 %v1185_v53, %v2445_v57  ;;  %vm1050_vm9 = vcmp.eq.f32.partialorder %v2586_v32, 0.0  ;;  %v1051_v46 = vand.u32 2147483648, %v2586_v32  ;;  %vm1055_vm5 = vcmp.eq.f32.partialorder %v2588_v41, inf }
 0x1f5   : > { %v1026_v7 = vmul.f32 %v1675_v56, %v2576_v31  ;;  %1680 = vrsqrt.f32 %v2612_v16  ;;  %v952_v61 = vsel %vm951_vm2, %v2543_v59, %v950_v43  ;;  %v2638_v6 = vmin.f32 %v1098_v52, 3e+38 }
 0x1f6   : > { %v1198_v17 = vmax.f32 %v1190_v63, 1e-12  ;;  %v1677_v57 = vpop.eup %1676  ;;  %1682 = vrsqrt.f32 %v2619_v60  ;;  %v1091_v18 = vadd.f32 %v1083_v39, %v2488_v27  ;;  %v1199_v19 = vmax.f32 %v1191_v4, 1e-12 }
 0x1f7   : > { %v1028_v2 = vsel %vm1027_vm4, %v2576_v31, %v1026_v7  ;;  %v1047_v9 = vmul.f32 %v1677_v57, %v2586_v32  ;;  %vm1057_vm0 = vcmp.eq.f32.partialorder %v2588_v41, 0.0  ;;  %v1202_v25 = vmax.f32 %v1194_v1, 1e-12 }
 0x1f8   : > { %v1031_v42 = vsel %vm1029_vm13, %v1030_v54, %v1028_v2  ;;  %v1679_v21 = vpop.eup %1678  ;;  %v955_v14 = vsel %vm953_vm6, %v954_v20, %v952_v61  ;;  %v1058_v30 = vand.u32 2147483648, %v2588_v41  ;;  %v2650_v51 = vmin.f32 %v1198_v17, 3e+38 }
 0x1f9   : > { %v1271_v12 = vsub.f32 %v927_v8, %v1031_v42  ;;  %v1054_v28 = vmul.f32 %v1679_v21, %v2588_v41  ;;  %v1049_v13 = vsel %vm1048_vm1, %v2586_v32, %v1047_v9  ;;  %1684 = vrsqrt.f32 %v2638_v6 }
 0x1fa   : > { %v2656_v36 = vmin.f32 %v1199_v19, 3e+38  ;;  %v1052_v59 = vsel %vm1050_vm9, %v1051_v46, %v1049_v13  ;;  %v1099_v15 = vmax.f32 %v1091_v18, 1e-12  ;;  %1686 = vrsqrt.f32 %v2650_v51 }
 0x1fb   : > { %v1279_v31 = vadd.f32 0.3, %v1271_v12  ;;  %v1056_v40 = vsel %vm1055_vm5, %v2588_v41, %v1054_v28  ;;  %v1274_v34 = vsub.f32 %v948_v58, %v1052_v59  ;;  %v2666_v35 = vmin.f32 %v1202_v25, 3e+38  ;;  %v1187_v41 = vpop.xlane.xlu0 %1186 }
 0x1fc   : > { %v1059_v29 = vsel %vm1057_vm0, %v1058_v30, %v1056_v40  ;;  %1688 = vrsqrt.f32 %v2656_v36  ;;  %v878_v39 = vadd.f32 %v865_v5, %v2574_v26  ;;  %v2673_v10 = vmin.f32 %v1099_v15, 3e+38 }
 0x1fd   : > { %v1287_v24 = vmax.f32 %v1279_v31, 0.0  ;;  %v1275_v37 = vsub.f32 %v955_v14, %v1059_v29  ;;  %v1282_v38 = vadd.f32 0.3, %v1274_v34  ;;  %1690 = vrsqrt.f32 %v2607_v48 }
 0x1fe   : > { %1692 = vrsqrt.f32 %v2666_v35  ;;  %v886_v23 = vmax.f32 %v878_v39, 1e-12  ;;  %v1195_v62 = vadd.f32 %v1187_v41, %v2488_v27  ;;  %vm1124_vm12 = vcmp.eq.f32.partialorder %v2612_v16, inf }
 0x1ff   : > { %1296 = vst.msk [vmem:[%s2402_s16 + $0x18] sm:$0xff] %vm1292_vm3, %v1287_v24  ;;  %v1681_v32 = vpop.eup %1680  ;;  %v1283_v44 = vadd.f32 0.3, %v1275_v37  ;;  %v1290_v45 = vmax.f32 %v1282_v38, 0.0  ;;  %vm1126_vm14 = vcmp.eq.f32.partialorder %v2612_v16, 0.0  ;;  %1694 = vrsqrt.f32 %v2673_v10 }
 0x200   : > { %v1683_v49 = vpop.eup %1682  ;;  %v1123_v3 = vmul.f32 %v1681_v32, %v2612_v16  ;;  %v1127_v33 = vand.u32 2147483648, %v2612_v16  ;;  %v2687_v11 = vmin.f32 %v886_v23, 3e+38  ;;  %v1203_v47 = vmax.f32 %v1195_v62, 1e-12 }
 0x201   : > { %v1291_v50 = vmax.f32 %v1283_v44, 0.0  ;;  %1299 = vst.msk [vmem:[%s2402_s16 + $0x30] sm:$0xff] %vm1292_vm3, %v1290_v45  ;;  %v1130_v0 = vmul.f32 %v1683_v49, %v2619_v60  ;;  %vm1131_vm10 = vcmp.eq.f32.partialorder %v2619_v60, inf  ;;  %vm1133_vm11 = vcmp.eq.f32.partialorder %v2619_v60, 0.0 }
 0x202   : > { %v1134_v27 = vand.u32 2147483648, %v2619_v60  ;;  %vm1152_vm15 = vcmp.eq.f32.partialorder %v2638_v6, inf  ;;  %v1125_v55 = vsel %vm1124_vm12, %v2612_v16, %v1123_v3  ;;  %vm1228_vm7 = vcmp.eq.f32.partialorder %v2650_v51, inf }
 0x203   : > { %1300 = vst.msk [vmem:[%s2402_s16 + $0x38] sm:$0xff] %vm1292_vm3, %v1291_v50  ;;  %v1685_v26 = vpop.eup %1684  ;;  %1696 = vrsqrt.f32 %v2687_v11  ;;  %vm1230_vm8 = vcmp.eq.f32.partialorder %v2650_v51, 0.0  ;;  %v1231_v54 = vand.u32 2147483648, %v2650_v51  ;;  %v2700_v52 = vmin.f32 %v1203_v47, 3e+38 }
 0x204   : > { %v1687_v22 = vpop.eup %1686  ;;  %v1151_v43 = vmul.f32 %v1685_v26, %v2638_v6  ;;  %v1132_v56 = vsel %vm1131_vm10, %v2619_v60, %v1130_v0  ;;  %vm1235_vm2 = vcmp.eq.f32.partialorder %v2656_v36, inf  ;;  %v1128_v8 = vsel %vm1126_vm14, %v1127_v33, %v1125_v55 }
 0x205   : > { %v1227_v20 = vmul.f32 %v1687_v22, %v2650_v51  ;;  %v1238_v1 = vand.u32 2147483648, %v2656_v36  ;;  %1698 = vrsqrt.f32 %v2700_v52  ;;  %v1155_v61 = vand.u32 2147483648, %v2638_v6 }
 0x206   : > { %v1689_v53 = vpop.eup %1688  ;;  %vm1237_vm6 = vcmp.eq.f32.partialorder %v2656_v36, 0.0  ;;  %v1135_v57 = vsel %vm1133_vm11, %v1134_v27, %v1132_v56  ;;  %v1153_v16 = vsel %vm1152_vm15, %v2638_v6, %v1151_v43  ;;  %vm1256_vm4 = vcmp.eq.f32.partialorder %v2666_v35, inf }
 0x207   : > { %v1229_v58 = vsel %vm1228_vm7, %v2650_v51, %v1227_v20  ;;  %v1234_v63 = vmul.f32 %v1689_v53, %v2656_v36  ;;  %v1691_v4 = vpop.eup %1690  ;;  %v1259_v12 = vand.u32 2147483648, %v2666_v35  ;;  %vm1154_vm13 = vcmp.eq.f32.partialorder %v2638_v6, 0.0 }
 0x208   : > { %v1232_v7 = vsel %vm1230_vm8, %v1231_v54, %v1229_v58  ;;  %v1693_v46 = vpop.eup %1692  ;;  %v1019_v25 = vmul.f32 %v1691_v4, %v2607_v48  ;;  %vm1258_vm1 = vcmp.eq.f32.partialorder %v2666_v35, 0.0  ;;  %v1156_v14 = vsel %vm1154_vm13, %v1155_v61, %v1153_v16 }
 0x209   : > { %v1303_v2 = vsub.f32 %v1128_v8, %v1232_v7  ;;  %v1236_v17 = vsel %vm1235_vm2, %v2656_v36, %v1234_v63  ;;  %v1255_v18 = vmul.f32 %v1693_v46, %v2666_v35  ;;  %v1695_v9 = vpop.eup %1694  ;;  %vm1020_vm9 = vcmp.eq.f32.partialorder %v2607_v48, inf }
 0x20a   : > { %v1239_v42 = vsel %vm1237_vm6, %v1238_v1, %v1236_v17  ;;  %v1158_v13 = vmul.f32 %v1695_v9, %v2673_v10  ;;  %v1021_v6 = vsel %vm1020_vm9, %v2607_v48, %v1019_v25  ;;  %vm1022_vm5 = vcmp.eq.f32.partialorder %v2607_v48, 0.0 }
 0x20b   : > { %v1311_v19 = vadd.f32 0.3, %v1303_v2  ;;  %v1304_v21 = vsub.f32 %v1135_v57, %v1239_v42  ;;  %v1257_v60 = vsel %vm1256_vm4, %v2666_v35, %v1255_v18  ;;  %v1023_v15 = vand.u32 2147483648, %v2607_v48 }
 0x20c   : > { %v1260_v51 = vsel %vm1258_vm1, %v1259_v12, %v1257_v60  ;;  %vm916_vm0 = vcmp.eq.f32.partialorder %v2687_v11, inf  ;;  %v919_v24 = vand.u32 2147483648, %v2687_v11  ;;  %vm1159_vm12 = vcmp.eq.f32.partialorder %v2673_v10, inf }
 0x20d   : > { %v1319_v28 = vmax.f32 %v1311_v19, 0.0  ;;  %v1312_v30 = vadd.f32 0.3, %v1304_v21  ;;  %v1307_v5 = vsub.f32 %v1156_v14, %v1260_v51  ;;  %v1697_v31 = vpop.eup %1696  ;;  %vm918_vm14 = vcmp.eq.f32.partialorder %v2687_v11, 0.0 }
 0x20e   : > { %v915_v40 = vmul.f32 %v1697_v31, %v2687_v11  ;;  %v1024_v37 = vsel %vm1022_vm5, %v1023_v15, %v1021_v6  ;;  %v1160_v38 = vsel %vm1159_vm12, %v2673_v10, %v1158_v13  ;;  %v1162_v32 = vand.u32 2147483648, %v2673_v10 }
 0x20f   : > { %1327 = vst.msk [vmem:[%s2519_s19 + $0x10] sm:$0xff] %vm1292_vm3, %v1319_v28  ;;  %v1320_v36 = vmax.f32 %v1312_v30, 0.0  ;;  %v1315_v59 = vadd.f32 0.3, %v1307_v5  ;;  %v1699_v34 = vpop.eup %1698  ;;  %vm1263_vm10 = vcmp.eq.f32.partialorder %v2700_v52, inf  ;;  %v1266_v41 = vand.u32 2147483648, %v2700_v52 }
 0x210   : > { %v917_v35 = vsel %vm916_vm0, %v2687_v11, %v915_v40  ;;  %v1262_v48 = vmul.f32 %v1699_v34, %v2700_v52  ;;  %vm1161_vm11 = vcmp.eq.f32.partialorder %v2673_v10, 0.0  ;;  %vm1265_vm15 = vcmp.eq.f32.partialorder %v2700_v52, 0.0 }
 0x211   : > { %1328 = vst.msk [vmem:[%s2519_s19 + $0x18] sm:$0xff] %vm1292_vm3, %v1320_v36  ;;  %v1323_v29 = vmax.f32 %v1315_v59, 0.0  ;;  %v920_v39 = vsel %vm918_vm14, %v919_v24, %v917_v35  ;;  %v1163_v49 = vsel %vm1161_vm11, %v1162_v32, %v1160_v38 }
 0x212   : > { %v1270_v44 = vsub.f32 %v920_v39, %v1024_v37  ;;  %v1264_v45 = vsel %vm1263_vm10, %v2700_v52, %v1262_v48 }
 0x213   : > { %1331 = vst.msk [vmem:[%s2519_s19 + $0x30] sm:$0xff] %vm1292_vm3, %v1323_v29  ;;  %v1267_v3 = vsel %vm1265_vm15, %v1266_v41, %v1264_v45 }
 0x214   : > { %v1278_v50 = vadd.f32 0.3, %v1270_v44  ;;  %v1308_v23 = vsub.f32 %v1163_v49, %v1267_v3 }
 0x216   : > { %v1286_v62 = vmax.f32 %v1278_v50, 0.0  ;;  %v1316_v26 = vadd.f32 0.3, %v1308_v23 }
 0x218   : > { %1295 = vst.msk [vmem:[%s2402_s16 + $0x10] sm:$0xff] %vm1292_vm3, %v1286_v62  ;;  %v1324_v33 = vmax.f32 %v1316_v26, 0.0 }
 0x21a   : > { %1332 = vst.msk [vmem:[%s2519_s19 + $0x38] sm:$0xff] %vm1292_vm3, %v1324_v33 }
 0x21b PF: > { %s18_s26 = sadd.s32 1, %s1722_s26   ;;  %s2884_s24 = smov %s1718_s25 }
 0x21c   : > { %p15_p5 = scmp.ge.s32.totalorder %s18_s26, 4   ;;  %s2885_s25 = smov %s2887_s27 }
 0x21e   :  { %17 = sbr.rel (!%p15_p5) target bundleno = 2 (0x2), region = 105 }

</bundles_post_ra>
